<compile_context>
chip_gen: v5e
topology: v5e:2x2
jax: 0.10.0
libtpu: 0.0.40
codegen_flags: <defaults>
</compile_context>

<pallas_src>
import jax
import jax.numpy as jnp
from jax.experimental import pallas as pl
from jax.experimental.pallas import tpu as pltpu

# ----- model hyper-parameters (small, consistent with the module) -----
V = 64           # vocab_size
VP = 128         # vocab padded to full lane width / MXU depth
E = 32           # embedding_size
T = 8            # sequence_len
H = 4            # num_heads
HS = E // H      # head_size
HID = 4 * E      # feed-forward hidden size (linear_hidden_size=None -> 4*E)
L = 2            # num_layers
B = 2            # batch
N = B * T        # flattened token count
CAUSAL = True
EPS = 1e-5       # PyTorch LayerNorm default

# ----- weight-slab row layout (bf16, 128 lanes wide; all offsets multiples of 16) -----
_TOK = 0                       # 128 rows, cols 0:E   -- tok_emb padded with zero rows
_POS = _TOK + VP               # N rows,  cols 0:E    -- pos_emb pre-tiled to (N, E)
_LAYER0 = _POS + N             # per-layer block start
_WQKV = 0                      # +0,   E rows,   cols 0:3E
_WPROJ = E                     # +32,  E rows,   cols 0:E
_W1 = 2 * E                    # +64,  E rows,   cols 0:HID
_W2 = 3 * E                    # +96,  HID rows, cols 0:E
_LSTRIDE = 3 * E + HID         # 224 rows per layer
_WH = _LAYER0 + L * _LSTRIDE   # E rows, cols 0:VP (cols V:VP zero)
RW = _WH + E                   # total rows = 624

# ----- small-params slab row layout (f32, 128 lanes wide) -----
_P_PER_LAYER = 7               # [ln1_g, ln1_b, ln2_g, ln2_b, bproj, b1, b2]
_P_LNF_G = L * _P_PER_LAYER    # 14
_P_LNF_B = _P_LNF_G + 1        # 15
_P_BH = _P_LNF_B + 1           # 16
RP = _P_BH + 1                 # 17 rows


def _layer_norm(x, g, b):
    mu = jnp.mean(x, axis=-1, keepdims=True)
    var = jnp.mean((x - mu) ** 2, axis=-1, keepdims=True)
    return (x - mu) * jax.lax.rsqrt(var + EPS) * g + b


# ------------------------- fused Pallas kernel -------------------------

def fused_forward_kernel(idx_ref, w_ref, p_ref, out_ref):
    """Entire forward pass (embeddings -> L blocks -> LN_f -> lm_head) in VMEM."""
    f32, bf16 = jnp.float32, jnp.bfloat16

    # --- embedding: exact one-hot matmul gather (contraction = 128) + positional add ---
    idx = idx_ref[...]                                             # (N, 1) int32
    vocab_iota = jax.lax.broadcasted_iota(jnp.int32, (N, VP), 1)
    onehot = (vocab_iota == idx).astype(bf16)                      # (N, VP)
    tok_emb = w_ref[_TOK:_TOK + VP, 0:E]                           # (VP, E) bf16
    pos = w_ref[_POS:_POS + N, 0:E].astype(f32)                    # (N, E), pre-tiled
    x = jnp.dot(onehot, tok_emb, preferred_element_type=f32) + pos  # (N, E) f32

    # causal mask, shared across layers / heads / batches (batched layout (H*B, T, T))
    row = jax.lax.broadcasted_iota(jnp.int32, (T, T), 0)
    col = jax.lax.broadcasted_iota(jnp.int32, (T, T), 1)
    causal = (col <= row)[None, :, :]                              # (1, T, T)
    scale = HS ** -0.5

    for layer in range(L):                                         # static unroll (L=2)
        base = _LAYER0 + layer * _LSTRIDE
        pbase = layer * _P_PER_LAYER

        # ---------- attention branch: x = x + Wproj(concat_heads(att)) + bproj ----------
        ln1_g = p_ref[pbase + 0:pbase + 1, 0:E]
        ln1_b = p_ref[pbase + 1:pbase + 2, 0:E]
        h = _layer_norm(x, ln1_g, ln1_b)                           # (N, E) f32

        # fused QKV projection: one (N, E) @ (E, 3E) matmul per layer
        wqkv = w_ref[base + _WQKV:base + _WQKV + E, 0:3 * E]       # (E, 3E) bf16
        qkv = jnp.dot(h.astype(bf16), wqkv, preferred_element_type=f32)   # (N, 3E) f32

        # regroup rows to head-major batched layout (H*B, T, HS) for one-shot einsums
        def to_heads(x2d):                                         # (N, E) -> (H*B, T, HS)
            return jnp.concatenate(
                [x2d[:, hd * HS:(hd + 1) * HS].reshape(B, T, HS) for hd in range(H)],
                axis=0)

        q = to_heads(qkv[:, 0:E])
        k = to_heads(qkv[:, E:2 * E])
        v = to_heads(qkv[:, 2 * E:3 * E])

        s = jnp.einsum('ntd,nsd->nts', q.astype(bf16), k.astype(bf16),
                       preferred_element_type=f32) * scale         # (H*B, T, T) f32
        if CAUSAL:
            s = jnp.where(causal, s, -1e30)
        s = s - jnp.max(s, axis=-1, keepdims=True)                 # softmax in f32
        prob = jnp.exp(s)
        prob = prob * pl.reciprocal(jnp.sum(prob, axis=-1, keepdims=True), approx=True)
        o = jnp.einsum('nts,nsd->ntd', prob.astype(bf16), v.astype(bf16),
                       preferred_element_type=f32)                 # (H*B, T, HS) f32

        # concat heads back on the lane axis -> (N, E); single (N,E)@(E,E) projection
        o_cat = jnp.concatenate(
            [o[hd * B:(hd + 1) * B].reshape(N, HS) for hd in range(H)], axis=-1)
        wproj = w_ref[base + _WPROJ:base + _WPROJ + E, 0:E]        # (E, E) bf16
        bproj = p_ref[pbase + 4:pbase + 5, 0:E]
        att = jnp.dot(o_cat.astype(bf16), wproj, preferred_element_type=f32) + bproj
        x = x + att                                                # residual (attention only)

        # ---------- feed-forward branch: NoYokeResidual -> output REPLACES x ----------
        ln2_g = p_ref[pbase + 2:pbase + 3, 0:E]
        ln2_b = p_ref[pbase + 3:pbase + 4, 0:E]
        h2 = _layer_norm(x, ln2_g, ln2_b)
        w1 = w_ref[base + _W1:base + _W1 + E, 0:HID]               # (E, HID) bf16
        b1 = p_ref[pbase + 5:pbase + 6, 0:HID]
        w2 = w_ref[base + _W2:base + _W2 + HID, 0:E]               # (HID, E) bf16
        b2 = p_ref[pbase + 6:pbase + 7, 0:E]
        f = jnp.dot(h2.astype(bf16), w1, preferred_element_type=f32) + b1
        f = jnp.maximum(f, 0.0)
        x = jnp.dot(f.astype(bf16), w2, preferred_element_type=f32) + b2
        # TODO(synk): dropout inside FeedFowardWithCompression is identity at inference.

    # ---------- final LayerNorm + lm_head: single lane-dense (N, 128) HBM write ----------
    lnf_g = p_ref[_P_LNF_G:_P_LNF_G + 1, 0:E]
    lnf_b = p_ref[_P_LNF_B:_P_LNF_B + 1, 0:E]
    hf = _layer_norm(x, lnf_g, lnf_b)
    wh = w_ref[_WH:_WH + E, 0:VP]                                  # (E, VP) bf16
    bh = p_ref[_P_BH:_P_BH + 1, 0:VP]
    out_ref[...] = jnp.dot(hf.astype(bf16), wh, preferred_element_type=f32) + bh


# ------------------------- pallas_call wrapper -------------------------

def _vspec(shape):
    n = len(shape)
    return pl.BlockSpec(shape, lambda i: (0,) * n)


@jax.jit
def forward_pallas(idx, wslab, pslab):
    """Full model forward via one fused Pallas kernel. Returns logits (B, T, V)."""
    idx2d = idx.reshape(N, 1).astype(jnp.int32)
    logits_p = pl.pallas_call(
        fused_forward_kernel,
        out_shape=jax.ShapeDtypeStruct((N, VP), jnp.float32),
        grid=(1,),
        in_specs=[
            _vspec((N, 1)),        # token ids
            _vspec((RW, 128)),     # packed bf16 weight slab (1 DMA)
            _vspec((RP, 128)),     # packed f32 LN/bias slab (1 DMA)
        ],
        out_specs=_vspec((N, VP)),
        compiler_params=pltpu.CompilerParams(dimension_semantics=("arbitrary",)),
    )(idx2d, wslab, pslab)
    return logits_p[:, :V].reshape(B, T, V)


# ------------------------- parameter init (deterministic) -------------------------

def init_params(key):
    ks = iter(jax.random.split(key, 4 + 4 * L))

    def bw(k, shape):  # bf16-stored weight (MXU-native input dtype)
        return (jax.random.normal(k, shape, jnp.float32) * 0.02).astype(jnp.bfloat16)

    p = {
        "tok_emb": bw(next(ks), (V, E)),
        "pos_emb": bw(next(ks), (T, E)),
        "lnf_g": jnp.ones((1, E), jnp.float32),
        "lnf_b": jnp.zeros((1, E), jnp.float32),
        "wh": bw(next(ks), (E, V)),
        "bh": jnp.zeros((1, V), jnp.float32),
        "blocks": [],
    }
    for _ in range(L):
        blk = dict(
            ln1_g=jnp.ones((1, E), jnp.float32), ln1_b=jnp.zeros((1, E), jnp.float32),
            wqkv=bw(next(ks), (E, 3 * E)),
            wproj=bw(next(ks), (E, E)),
            bproj=jnp.zeros((1, E), jnp.float32),
            ln2_g=jnp.ones((1, E), jnp.float32), ln2_b=jnp.zeros((1, E), jnp.float32),
            w1=bw(next(ks), (E, HID)), b1=jnp.zeros((1, HID), jnp.float32),
            w2=bw(next(ks), (HID, E)), b2=jnp.zeros((1, E), jnp.float32),
        )
        p["blocks"].append(blk)
    return p


def pack_params(p):
    """One-time host-side re-layout into two slabs (all DMA consolidation happens here)."""
    w = jnp.zeros((RW, 128), jnp.bfloat16)
    w = w.at[_TOK:_TOK + V, 0:E].set(p["tok_emb"])                 # rows V:VP stay zero
    w = w.at[_POS:_POS + N, 0:E].set(jnp.tile(p["pos_emb"], (B, 1)))
    for l, blk in enumerate(p["blocks"]):
        base = _LAYER0 + l * _LSTRIDE
        w = w.at[base + _WQKV:base + _WQKV + E, 0:3 * E].set(blk["wqkv"])
        w = w.at[base + _WPROJ:base + _WPROJ + E, 0:E].set(blk["wproj"])
        w = w.at[base + _W1:base + _W1 + E, 0:HID].set(blk["w1"])
        w = w.at[base + _W2:base + _W2 + HID, 0:E].set(blk["w2"])
    w = w.at[_WH:_WH + E, 0:V].set(p["wh"])                        # cols V:VP stay zero

    s = jnp.zeros((RP, 128), jnp.float32)
    for l, blk in enumerate(p["blocks"]):
        pb = l * _P_PER_LAYER
        s = s.at[pb + 0, 0:E].set(blk["ln1_g"][0])
        s = s.at[pb + 1, 0:E].set(blk["ln1_b"][0])
        s = s.at[pb + 2, 0:E].set(blk["ln2_g"][0])
        s = s.at[pb + 3, 0:E].set(blk["ln2_b"][0])
        s = s.at[pb + 4, 0:E].set(blk["bproj"][0])
        s = s.at[pb + 5, 0:HID].set(blk["b1"][0])
        s = s.at[pb + 6, 0:E].set(blk["b2"][0])
    s = s.at[_P_LNF_G, 0:E].set(p["lnf_g"][0])
    s = s.at[_P_LNF_B, 0:E].set(p["lnf_b"][0])
    s = s.at[_P_BH, 0:V].set(p["bh"][0])
    return w, s


# ------------------------- pure-JAX reference (for verification) -------------------------

def forward_ref(idx, p):
    """f32 reference using the same (bf16-stored) weight values."""
    f32 = jnp.float32
    tok = p["tok_emb"].astype(f32)[idx]                            # (B, T, E)
    pos = p["pos_emb"].astype(f32)[jnp.arange(T)]
    x = tok + pos[None, :, :]
    row = jnp.arange(T)[:, None]
    col = jnp.arange(T)[None, :]
    for blk in p["blocks"]:
        h = _layer_norm(x, blk["ln1_g"], blk["ln1_b"])
        qkv = h @ blk["wqkv"].astype(f32)
        q, k, v = qkv[..., 0:E], qkv[..., E:2 * E], qkv[..., 2 * E:3 * E]
        outs = []
        for hd in range(H):
            sl = slice(hd * HS, (hd + 1) * HS)
            wei = jnp.einsum("btd,bsd->bts", q[..., sl], k[..., sl]) * (HS ** -0.5)
            if CAUSAL:
                wei = jnp.where(col <= row, wei, -1e30)
            wei = jax.nn.softmax(wei, axis=-1)
            outs.append(jnp.einsum("bts,bsd->btd", wei, v[..., sl]))
        att = jnp.concatenate(outs, axis=-1) @ blk["wproj"].astype(f32) + blk["bproj"]
        x = x + att
        h2 = _layer_norm(x, blk["ln2_g"], blk["ln2_b"])
        f = jnp.maximum(h2 @ blk["w1"].astype(f32) + blk["b1"], 0.0)
        x = f @ blk["w2"].astype(f32) + blk["b2"]                  # NoYokeResidual: no residual
    hf = _layer_norm(x, p["lnf_g"], p["lnf_b"])
    return hf @ p["wh"].astype(f32) + p["bh"]


if __name__ == "__main__":
    key = jax.random.PRNGKey(0)
    k_param, k_idx = jax.random.split(key)
    params = init_params(k_param)
    wslab, pslab = pack_params(params)
    idx = jax.random.randint(k_idx, (B, T), 0, V, dtype=jnp.int32)

    logits = forward_pallas(idx, wslab, pslab)
    logits = jax.block_until_ready(logits)

    ref = forward_ref(idx, params)
    assert logits.shape == (B, T, V), logits.shape
    # tolerance covers bf16 MXU inputs and the EUP approximate reciprocal in softmax
    err = jnp.max(jnp.abs(logits - ref))
    assert jnp.allclose(logits, ref, rtol=1e-2, atol=1e-2), f"max abs err {err}"
    print("KERNEL_OK")
</pallas_src>

<mosaic_0001>
module attributes {stable_mosaic.version = 11 : i64} {
  func.func @fused_forward_kernel(%arg0: i32, %arg1: memref<16x1xi32, #tpu.memory_space<vmem>>, %arg2: memref<624x128xbf16, #tpu.memory_space<vmem>>, %arg3: memref<17x128xf32, #tpu.memory_space<vmem>>, %arg4: memref<16x128xf32, #tpu.memory_space<vmem>>) attributes {dimension_semantics = [#tpu.dimension_semantics<arbitrary>], iteration_bounds = array<i64: 1>, scalar_prefetch = 0 : i64, scratch_operands = 0 : i64, tpu.core_type = #tpu.core_type<tc>, window_params = [{pipeline_mode = #tpu.pipeline_mode<synchronous>, transform_indices = @transform_0, window_bounds = array<i64: 16, 1>}, {pipeline_mode = #tpu.pipeline_mode<synchronous>, transform_indices = @transform_1, window_bounds = array<i64: 624, 128>}, {pipeline_mode = #tpu.pipeline_mode<synchronous>, transform_indices = @transform_2, window_bounds = array<i64: 17, 128>}, {pipeline_mode = #tpu.pipeline_mode<synchronous>, transform_indices = @transform_3, window_bounds = array<i64: 16, 128>}]} {
    %c0 = arith.constant 0 : index
    %c0_0 = arith.constant 0 : index
    %0 = vector.load %arg1[%c0, %c0_0] : memref<16x1xi32, #tpu.memory_space<vmem>>, vector<16x1xi32>
    %1 = tpu.iota {dimensions = array<i32: 1>} : vector<16x128xi32>
    %2 = vector.broadcast %0 : vector<16x1xi32> to vector<16x128xi32>
    %3 = arith.cmpi eq, %1, %2 : vector<16x128xi32>
    %4 = arith.extui %3 : vector<16x128xi1> to vector<16x128xi32>
    %5 = arith.sitofp %4 : vector<16x128xi32> to vector<16x128xf32>
    %6 = arith.truncf %5 : vector<16x128xf32> to vector<16x128xbf16>
    %c0_1 = arith.constant 0 : index
    %c0_2 = arith.constant 0 : index
    %7 = vector.load %arg2[%c0_1, %c0_2] : memref<624x128xbf16, #tpu.memory_space<vmem>>, vector<128x32xbf16>
    %c128 = arith.constant 128 : index
    %c0_3 = arith.constant 0 : index
    %8 = vector.load %arg2[%c128, %c0_3] : memref<624x128xbf16, #tpu.memory_space<vmem>>, vector<16x32xbf16>
    %9 = arith.extf %8 : vector<16x32xbf16> to vector<16x32xf32>
    %cst = arith.constant dense<0.000000e+00> : vector<16x32xf32>
    %10 = tpu.matmul %6, %7, %cst {dimension_numbers = #tpu.dot_dimension_numbers<[1], [0], [0], [1], [0, 0, 1, 1], [], []>} : vector<16x128xbf16>, vector<128x32xbf16>, vector<16x32xf32> -> vector<16x32xf32>
    %11 = arith.addf %10, %9 : vector<16x32xf32>
    %12 = tpu.iota {dimensions = array<i32: 0>} : vector<8x8xi32>
    %13 = tpu.iota {dimensions = array<i32: 1>} : vector<8x8xi32>
    %14 = arith.cmpi sle, %13, %12 : vector<8x8xi32>
    %15 = vector.shape_cast %14 : vector<8x8xi1> to vector<1x8x8xi1>
    %c0_4 = arith.constant 0 : index
    %c0_5 = arith.constant 0 : index
    %16 = vector.load %arg3[%c0_4, %c0_5] : memref<17x128xf32, #tpu.memory_space<vmem>>, vector<1x32xf32>
    %c1 = arith.constant 1 : index
    %c0_6 = arith.constant 0 : index
    %17 = vector.load %arg3[%c1, %c0_6] : memref<17x128xf32, #tpu.memory_space<vmem>>, vector<1x32xf32>
    %cst_7 = arith.constant dense<0.000000e+00> : vector<16xf32>
    %18 = vector.multi_reduction <add>, %11, %cst_7 [1] : vector<16x32xf32> to vector<16xf32>
    %19 = vector.shape_cast %18 : vector<16xf32> to vector<16x1xf32>
    %cst_8 = arith.constant 3.200000e+01 : f32
    %20 = vector.broadcast %cst_8 : f32 to vector<16x1xf32>
    %21 = arith.divf %19, %20 : vector<16x1xf32>
    %22 = vector.broadcast %21 : vector<16x1xf32> to vector<16x32xf32>
    %23 = arith.subf %11, %22 : vector<16x32xf32>
    %24 = arith.mulf %23, %23 : vector<16x32xf32>
    %cst_9 = arith.constant dense<0.000000e+00> : vector<16xf32>
    %25 = vector.multi_reduction <add>, %24, %cst_9 [1] : vector<16x32xf32> to vector<16xf32>
    %26 = vector.shape_cast %25 : vector<16xf32> to vector<16x1xf32>
    %cst_10 = arith.constant 3.200000e+01 : f32
    %27 = vector.broadcast %cst_10 : f32 to vector<16x1xf32>
    %28 = arith.divf %26, %27 : vector<16x1xf32>
    %29 = vector.broadcast %21 : vector<16x1xf32> to vector<16x32xf32>
    %30 = arith.subf %11, %29 : vector<16x32xf32>
    %cst_11 = arith.constant 9.99999974E-6 : f32
    %31 = vector.broadcast %cst_11 : f32 to vector<16x1xf32>
    %32 = arith.addf %28, %31 : vector<16x1xf32>
    %33 = math.rsqrt %32 : vector<16x1xf32>
    %34 = vector.broadcast %33 : vector<16x1xf32> to vector<16x32xf32>
    %35 = arith.mulf %30, %34 : vector<16x32xf32>
    %36 = vector.broadcast %16 : vector<1x32xf32> to vector<16x32xf32>
    %37 = arith.mulf %35, %36 : vector<16x32xf32>
    %38 = vector.broadcast %17 : vector<1x32xf32> to vector<16x32xf32>
    %39 = arith.addf %37, %38 : vector<16x32xf32>
    %c144 = arith.constant 144 : index
    %c0_12 = arith.constant 0 : index
    %40 = vector.load %arg2[%c144, %c0_12] : memref<624x128xbf16, #tpu.memory_space<vmem>>, vector<32x96xbf16>
    %41 = arith.truncf %39 : vector<16x32xf32> to vector<16x32xbf16>
    %cst_13 = arith.constant dense<0.000000e+00> : vector<16x96xf32>
    %42 = tpu.matmul %41, %40, %cst_13 {dimension_numbers = #tpu.dot_dimension_numbers<[1], [0], [0], [1], [0, 0, 1, 1], [], []>} : vector<16x32xbf16>, vector<32x96xbf16>, vector<16x96xf32> -> vector<16x96xf32>
    %43 = vector.extract_strided_slice %42 {offsets = [0, 0], sizes = [16, 32], strides = [1, 1]} : vector<16x96xf32> to vector<16x32xf32>
    %44 = vector.extract_strided_slice %43 {offsets = [0, 0], sizes = [16, 8], strides = [1, 1]} : vector<16x32xf32> to vector<16x8xf32>
    %45 = vector.shape_cast %44 : vector<16x8xf32> to vector<2x8x8xf32>
    %46 = vector.extract_strided_slice %43 {offsets = [0, 8], sizes = [16, 8], strides = [1, 1]} : vector<16x32xf32> to vector<16x8xf32>
    %47 = vector.shape_cast %46 : vector<16x8xf32> to vector<2x8x8xf32>
    %48 = vector.extract_strided_slice %43 {offsets = [0, 16], sizes = [16, 8], strides = [1, 1]} : vector<16x32xf32> to vector<16x8xf32>
    %49 = vector.shape_cast %48 : vector<16x8xf32> to vector<2x8x8xf32>
    %50 = vector.extract_strided_slice %43 {offsets = [0, 24], sizes = [16, 8], strides = [1, 1]} : vector<16x32xf32> to vector<16x8xf32>
    %51 = vector.shape_cast %50 : vector<16x8xf32> to vector<2x8x8xf32>
    %52 = tpu.concatenate %45, %47, %49, %51 in 0 : vector<2x8x8xf32>, vector<2x8x8xf32>, vector<2x8x8xf32>, vector<2x8x8xf32> -> vector<8x8x8xf32>
    %53 = vector.extract_strided_slice %42 {offsets = [0, 32], sizes = [16, 32], strides = [1, 1]} : vector<16x96xf32> to vector<16x32xf32>
    %54 = vector.extract_strided_slice %53 {offsets = [0, 0], sizes = [16, 8], strides = [1, 1]} : vector<16x32xf32> to vector<16x8xf32>
    %55 = vector.shape_cast %54 : vector<16x8xf32> to vector<2x8x8xf32>
    %56 = vector.extract_strided_slice %53 {offsets = [0, 8], sizes = [16, 8], strides = [1, 1]} : vector<16x32xf32> to vector<16x8xf32>
    %57 = vector.shape_cast %56 : vector<16x8xf32> to vector<2x8x8xf32>
    %58 = vector.extract_strided_slice %53 {offsets = [0, 16], sizes = [16, 8], strides = [1, 1]} : vector<16x32xf32> to vector<16x8xf32>
    %59 = vector.shape_cast %58 : vector<16x8xf32> to vector<2x8x8xf32>
    %60 = vector.extract_strided_slice %53 {offsets = [0, 24], sizes = [16, 8], strides = [1, 1]} : vector<16x32xf32> to vector<16x8xf32>
    %61 = vector.shape_cast %60 : vector<16x8xf32> to vector<2x8x8xf32>
    %62 = tpu.concatenate %55, %57, %59, %61 in 0 : vector<2x8x8xf32>, vector<2x8x8xf32>, vector<2x8x8xf32>, vector<2x8x8xf32> -> vector<8x8x8xf32>
    %63 = vector.extract_strided_slice %42 {offsets = [0, 64], sizes = [16, 32], strides = [1, 1]} : vector<16x96xf32> to vector<16x32xf32>
    %64 = vector.extract_strided_slice %63 {offsets = [0, 0], sizes = [16, 8], strides = [1, 1]} : vector<16x32xf32> to vector<16x8xf32>
    %65 = vector.shape_cast %64 : vector<16x8xf32> to vector<2x8x8xf32>
    %66 = vector.extract_strided_slice %63 {offsets = [0, 8], sizes = [16, 8], strides = [1, 1]} : vector<16x32xf32> to vector<16x8xf32>
    %67 = vector.shape_cast %66 : vector<16x8xf32> to vector<2x8x8xf32>
    %68 = vector.extract_strided_slice %63 {offsets = [0, 16], sizes = [16, 8], strides = [1, 1]} : vector<16x32xf32> to vector<16x8xf32>
    %69 = vector.shape_cast %68 : vector<16x8xf32> to vector<2x8x8xf32>
    %70 = vector.extract_strided_slice %63 {offsets = [0, 24], sizes = [16, 8], strides = [1, 1]} : vector<16x32xf32> to vector<16x8xf32>
    %71 = vector.shape_cast %70 : vector<16x8xf32> to vector<2x8x8xf32>
    %72 = tpu.concatenate %65, %67, %69, %71 in 0 : vector<2x8x8xf32>, vector<2x8x8xf32>, vector<2x8x8xf32>, vector<2x8x8xf32> -> vector<8x8x8xf32>
    %73 = arith.truncf %52 : vector<8x8x8xf32> to vector<8x8x8xbf16>
    %74 = arith.truncf %62 : vector<8x8x8xf32> to vector<8x8x8xbf16>
    "tpu.trace_start"() <{level = 10 : i32, message = "ntd,nsd->nts"}> : () -> ()
    %cst_14 = arith.constant dense<0.000000e+00> : vector<8x8x8xf32>
    %75 = tpu.matmul %73, %74, %cst_14 {dimension_numbers = #tpu.dot_dimension_numbers<[2], [2], [1], [1], [0, 0, 0, 1, 1, 1], [0], [0]>} : vector<8x8x8xbf16>, vector<8x8x8xbf16>, vector<8x8x8xf32> -> vector<8x8x8xf32>
    "tpu.trace_stop"() : () -> ()
    %cst_15 = arith.constant 0.353553385 : f32
    %76 = vector.broadcast %cst_15 : f32 to vector<8x8x8xf32>
    %77 = arith.mulf %75, %76 : vector<8x8x8xf32>
    %cst_16 = arith.constant -1.000000e+30 : f32
    %78 = vector.shape_cast %15 : vector<1x8x8xi1> to vector<1x8x8xi1>
    %79 = vector.broadcast %78 : vector<1x8x8xi1> to vector<8x8x8xi1>
    %80 = vector.broadcast %cst_16 : f32 to vector<8x8x8xf32>
    %81 = arith.select %79, %77, %80 : vector<8x8x8xi1>, vector<8x8x8xf32>
    %cst_17 = arith.constant dense<0xFF800000> : vector<8x8xf32>
    %82 = vector.multi_reduction <maximumf>, %81, %cst_17 [2] : vector<8x8x8xf32> to vector<8x8xf32>
    %83 = vector.shape_cast %82 : vector<8x8xf32> to vector<8x8x1xf32>
    %84 = vector.broadcast %83 : vector<8x8x1xf32> to vector<8x8x8xf32>
    %85 = arith.subf %81, %84 : vector<8x8x8xf32>
    %86 = math.exp %85 : vector<8x8x8xf32>
    %cst_18 = arith.constant dense<0.000000e+00> : vector<8x8xf32>
    %87 = vector.multi_reduction <add>, %86, %cst_18 [2] : vector<8x8x8xf32> to vector<8x8xf32>
    %88 = vector.shape_cast %87 : vector<8x8xf32> to vector<8x8x1xf32>
    %89 = tpu.reciprocal %88 {approx = true} : vector<8x8x1xf32> -> vector<8x8x1xf32>
    %90 = vector.broadcast %89 : vector<8x8x1xf32> to vector<8x8x8xf32>
    %91 = arith.mulf %86, %90 : vector<8x8x8xf32>
    %92 = arith.truncf %91 : vector<8x8x8xf32> to vector<8x8x8xbf16>
    %93 = arith.truncf %72 : vector<8x8x8xf32> to vector<8x8x8xbf16>
    "tpu.trace_start"() <{level = 10 : i32, message = "nts,nsd->ntd"}> : () -> ()
    %cst_19 = arith.constant dense<0.000000e+00> : vector<8x8x8xf32>
    %94 = tpu.matmul %92, %93, %cst_19 {dimension_numbers = #tpu.dot_dimension_numbers<[2], [1], [1], [2], [0, 0, 0, 1, 1, 2], [0], [0]>} : vector<8x8x8xbf16>, vector<8x8x8xbf16>, vector<8x8x8xf32> -> vector<8x8x8xf32>
    "tpu.trace_stop"() : () -> ()
    %95 = vector.extract_strided_slice %94 {offsets = [0, 0, 0], sizes = [2, 8, 8], strides = [1, 1, 1]} : vector<8x8x8xf32> to vector<2x8x8xf32>
    %96 = vector.shape_cast %95 : vector<2x8x8xf32> to vector<16x8xf32>
    %97 = vector.extract_strided_slice %94 {offsets = [2, 0, 0], sizes = [2, 8, 8], strides = [1, 1, 1]} : vector<8x8x8xf32> to vector<2x8x8xf32>
    %98 = vector.shape_cast %97 : vector<2x8x8xf32> to vector<16x8xf32>
    %99 = vector.extract_strided_slice %94 {offsets = [4, 0, 0], sizes = [2, 8, 8], strides = [1, 1, 1]} : vector<8x8x8xf32> to vector<2x8x8xf32>
    %100 = vector.shape_cast %99 : vector<2x8x8xf32> to vector<16x8xf32>
    %101 = vector.extract_strided_slice %94 {offsets = [6, 0, 0], sizes = [2, 8, 8], strides = [1, 1, 1]} : vector<8x8x8xf32> to vector<2x8x8xf32>
    %102 = vector.shape_cast %101 : vector<2x8x8xf32> to vector<16x8xf32>
    %103 = tpu.concatenate %96, %98, %100, %102 in 1 : vector<16x8xf32>, vector<16x8xf32>, vector<16x8xf32>, vector<16x8xf32> -> vector<16x32xf32>
    %c176 = arith.constant 176 : index
    %c0_20 = arith.constant 0 : index
    %104 = vector.load %arg2[%c176, %c0_20] : memref<624x128xbf16, #tpu.memory_space<vmem>>, vector<32x32xbf16>
    %c4 = arith.constant 4 : index
    %c0_21 = arith.constant 0 : index
    %105 = vector.load %arg3[%c4, %c0_21] : memref<17x128xf32, #tpu.memory_space<vmem>>, vector<1x32xf32>
    %106 = arith.truncf %103 : vector<16x32xf32> to vector<16x32xbf16>
    %cst_22 = arith.constant dense<0.000000e+00> : vector<16x32xf32>
    %107 = tpu.matmul %106, %104, %cst_22 {dimension_numbers = #tpu.dot_dimension_numbers<[1], [0], [0], [1], [0, 0, 1, 1], [], []>} : vector<16x32xbf16>, vector<32x32xbf16>, vector<16x32xf32> -> vector<16x32xf32>
    %108 = vector.broadcast %105 : vector<1x32xf32> to vector<16x32xf32>
    %109 = arith.addf %107, %108 : vector<16x32xf32>
    %110 = arith.addf %11, %109 : vector<16x32xf32>
    %c2 = arith.constant 2 : index
    %c0_23 = arith.constant 0 : index
    %111 = vector.load %arg3[%c2, %c0_23] : memref<17x128xf32, #tpu.memory_space<vmem>>, vector<1x32xf32>
    %c3 = arith.constant 3 : index
    %c0_24 = arith.constant 0 : index
    %112 = vector.load %arg3[%c3, %c0_24] : memref<17x128xf32, #tpu.memory_space<vmem>>, vector<1x32xf32>
    %cst_25 = arith.constant dense<0.000000e+00> : vector<16xf32>
    %113 = vector.multi_reduction <add>, %110, %cst_25 [1] : vector<16x32xf32> to vector<16xf32>
    %114 = vector.shape_cast %113 : vector<16xf32> to vector<16x1xf32>
    %cst_26 = arith.constant 3.200000e+01 : f32
    %115 = vector.broadcast %cst_26 : f32 to vector<16x1xf32>
    %116 = arith.divf %114, %115 : vector<16x1xf32>
    %117 = vector.broadcast %116 : vector<16x1xf32> to vector<16x32xf32>
    %118 = arith.subf %110, %117 : vector<16x32xf32>
    %119 = arith.mulf %118, %118 : vector<16x32xf32>
    %cst_27 = arith.constant dense<0.000000e+00> : vector<16xf32>
    %120 = vector.multi_reduction <add>, %119, %cst_27 [1] : vector<16x32xf32> to vector<16xf32>
    %121 = vector.shape_cast %120 : vector<16xf32> to vector<16x1xf32>
    %cst_28 = arith.constant 3.200000e+01 : f32
    %122 = vector.broadcast %cst_28 : f32 to vector<16x1xf32>
    %123 = arith.divf %121, %122 : vector<16x1xf32>
    %124 = vector.broadcast %116 : vector<16x1xf32> to vector<16x32xf32>
    %125 = arith.subf %110, %124 : vector<16x32xf32>
    %cst_29 = arith.constant 9.99999974E-6 : f32
    %126 = vector.broadcast %cst_29 : f32 to vector<16x1xf32>
    %127 = arith.addf %123, %126 : vector<16x1xf32>
    %128 = math.rsqrt %127 : vector<16x1xf32>
    %129 = vector.broadcast %128 : vector<16x1xf32> to vector<16x32xf32>
    %130 = arith.mulf %125, %129 : vector<16x32xf32>
    %131 = vector.broadcast %111 : vector<1x32xf32> to vector<16x32xf32>
    %132 = arith.mulf %130, %131 : vector<16x32xf32>
    %133 = vector.broadcast %112 : vector<1x32xf32> to vector<16x32xf32>
    %134 = arith.addf %132, %133 : vector<16x32xf32>
    %c208 = arith.constant 208 : index
    %c0_30 = arith.constant 0 : index
    %135 = vector.load %arg2[%c208, %c0_30] : memref<624x128xbf16, #tpu.memory_space<vmem>>, vector<32x128xbf16>
    %c5 = arith.constant 5 : index
    %c0_31 = arith.constant 0 : index
    %136 = vector.load %arg3[%c5, %c0_31] : memref<17x128xf32, #tpu.memory_space<vmem>>, vector<1x128xf32>
    %c240 = arith.constant 240 : index
    %c0_32 = arith.constant 0 : index
    %137 = vector.load %arg2[%c240, %c0_32] : memref<624x128xbf16, #tpu.memory_space<vmem>>, vector<128x32xbf16>
    %c6 = arith.constant 6 : index
    %c0_33 = arith.constant 0 : index
    %138 = vector.load %arg3[%c6, %c0_33] : memref<17x128xf32, #tpu.memory_space<vmem>>, vector<1x32xf32>
    %139 = arith.truncf %134 : vector<16x32xf32> to vector<16x32xbf16>
    %cst_34 = arith.constant dense<0.000000e+00> : vector<16x128xf32>
    %140 = tpu.matmul %139, %135, %cst_34 {dimension_numbers = #tpu.dot_dimension_numbers<[1], [0], [0], [1], [0, 0, 1, 1], [], []>} : vector<16x32xbf16>, vector<32x128xbf16>, vector<16x128xf32> -> vector<16x128xf32>
    %141 = vector.broadcast %136 : vector<1x128xf32> to vector<16x128xf32>
    %142 = arith.addf %140, %141 : vector<16x128xf32>
    %cst_35 = arith.constant 0.000000e+00 : f32
    %143 = vector.broadcast %cst_35 : f32 to vector<16x128xf32>
    %144 = arith.maximumf %142, %143 : vector<16x128xf32>
    %145 = arith.truncf %144 : vector<16x128xf32> to vector<16x128xbf16>
    %cst_36 = arith.constant dense<0.000000e+00> : vector<16x32xf32>
    %146 = tpu.matmul %145, %137, %cst_36 {dimension_numbers = #tpu.dot_dimension_numbers<[1], [0], [0], [1], [0, 0, 1, 1], [], []>} : vector<16x128xbf16>, vector<128x32xbf16>, vector<16x32xf32> -> vector<16x32xf32>
    %147 = vector.broadcast %138 : vector<1x32xf32> to vector<16x32xf32>
    %148 = arith.addf %146, %147 : vector<16x32xf32>
    %c7 = arith.constant 7 : index
    %c0_37 = arith.constant 0 : index
    %149 = vector.load %arg3[%c7, %c0_37] : memref<17x128xf32, #tpu.memory_space<vmem>>, vector<1x32xf32>
    %c8 = arith.constant 8 : index
    %c0_38 = arith.constant 0 : index
    %150 = vector.load %arg3[%c8, %c0_38] : memref<17x128xf32, #tpu.memory_space<vmem>>, vector<1x32xf32>
    %cst_39 = arith.constant dense<0.000000e+00> : vector<16xf32>
    %151 = vector.multi_reduction <add>, %148, %cst_39 [1] : vector<16x32xf32> to vector<16xf32>
    %152 = vector.shape_cast %151 : vector<16xf32> to vector<16x1xf32>
    %cst_40 = arith.constant 3.200000e+01 : f32
    %153 = vector.broadcast %cst_40 : f32 to vector<16x1xf32>
    %154 = arith.divf %152, %153 : vector<16x1xf32>
    %155 = vector.broadcast %154 : vector<16x1xf32> to vector<16x32xf32>
    %156 = arith.subf %148, %155 : vector<16x32xf32>
    %157 = arith.mulf %156, %156 : vector<16x32xf32>
    %cst_41 = arith.constant dense<0.000000e+00> : vector<16xf32>
    %158 = vector.multi_reduction <add>, %157, %cst_41 [1] : vector<16x32xf32> to vector<16xf32>
    %159 = vector.shape_cast %158 : vector<16xf32> to vector<16x1xf32>
    %cst_42 = arith.constant 3.200000e+01 : f32
    %160 = vector.broadcast %cst_42 : f32 to vector<16x1xf32>
    %161 = arith.divf %159, %160 : vector<16x1xf32>
    %162 = vector.broadcast %154 : vector<16x1xf32> to vector<16x32xf32>
    %163 = arith.subf %148, %162 : vector<16x32xf32>
    %cst_43 = arith.constant 9.99999974E-6 : f32
    %164 = vector.broadcast %cst_43 : f32 to vector<16x1xf32>
    %165 = arith.addf %161, %164 : vector<16x1xf32>
    %166 = math.rsqrt %165 : vector<16x1xf32>
    %167 = vector.broadcast %166 : vector<16x1xf32> to vector<16x32xf32>
    %168 = arith.mulf %163, %167 : vector<16x32xf32>
    %169 = vector.broadcast %149 : vector<1x32xf32> to vector<16x32xf32>
    %170 = arith.mulf %168, %169 : vector<16x32xf32>
    %171 = vector.broadcast %150 : vector<1x32xf32> to vector<16x32xf32>
    %172 = arith.addf %170, %171 : vector<16x32xf32>
    %c368 = arith.constant 368 : index
    %c0_44 = arith.constant 0 : index
    %173 = vector.load %arg2[%c368, %c0_44] : memref<624x128xbf16, #tpu.memory_space<vmem>>, vector<32x96xbf16>
    %174 = arith.truncf %172 : vector<16x32xf32> to vector<16x32xbf16>
    %cst_45 = arith.constant dense<0.000000e+00> : vector<16x96xf32>
    %175 = tpu.matmul %174, %173, %cst_45 {dimension_numbers = #tpu.dot_dimension_numbers<[1], [0], [0], [1], [0, 0, 1, 1], [], []>} : vector<16x32xbf16>, vector<32x96xbf16>, vector<16x96xf32> -> vector<16x96xf32>
    %176 = vector.extract_strided_slice %175 {offsets = [0, 0], sizes = [16, 32], strides = [1, 1]} : vector<16x96xf32> to vector<16x32xf32>
    %177 = vector.extract_strided_slice %176 {offsets = [0, 0], sizes = [16, 8], strides = [1, 1]} : vector<16x32xf32> to vector<16x8xf32>
    %178 = vector.shape_cast %177 : vector<16x8xf32> to vector<2x8x8xf32>
    %179 = vector.extract_strided_slice %176 {offsets = [0, 8], sizes = [16, 8], strides = [1, 1]} : vector<16x32xf32> to vector<16x8xf32>
    %180 = vector.shape_cast %179 : vector<16x8xf32> to vector<2x8x8xf32>
    %181 = vector.extract_strided_slice %176 {offsets = [0, 16], sizes = [16, 8], strides = [1, 1]} : vector<16x32xf32> to vector<16x8xf32>
    %182 = vector.shape_cast %181 : vector<16x8xf32> to vector<2x8x8xf32>
    %183 = vector.extract_strided_slice %176 {offsets = [0, 24], sizes = [16, 8], strides = [1, 1]} : vector<16x32xf32> to vector<16x8xf32>
    %184 = vector.shape_cast %183 : vector<16x8xf32> to vector<2x8x8xf32>
    %185 = tpu.concatenate %178, %180, %182, %184 in 0 : vector<2x8x8xf32>, vector<2x8x8xf32>, vector<2x8x8xf32>, vector<2x8x8xf32> -> vector<8x8x8xf32>
    %186 = vector.extract_strided_slice %175 {offsets = [0, 32], sizes = [16, 32], strides = [1, 1]} : vector<16x96xf32> to vector<16x32xf32>
    %187 = vector.extract_strided_slice %186 {offsets = [0, 0], sizes = [16, 8], strides = [1, 1]} : vector<16x32xf32> to vector<16x8xf32>
    %188 = vector.shape_cast %187 : vector<16x8xf32> to vector<2x8x8xf32>
    %189 = vector.extract_strided_slice %186 {offsets = [0, 8], sizes = [16, 8], strides = [1, 1]} : vector<16x32xf32> to vector<16x8xf32>
    %190 = vector.shape_cast %189 : vector<16x8xf32> to vector<2x8x8xf32>
    %191 = vector.extract_strided_slice %186 {offsets = [0, 16], sizes = [16, 8], strides = [1, 1]} : vector<16x32xf32> to vector<16x8xf32>
    %192 = vector.shape_cast %191 : vector<16x8xf32> to vector<2x8x8xf32>
    %193 = vector.extract_strided_slice %186 {offsets = [0, 24], sizes = [16, 8], strides = [1, 1]} : vector<16x32xf32> to vector<16x8xf32>
    %194 = vector.shape_cast %193 : vector<16x8xf32> to vector<2x8x8xf32>
    %195 = tpu.concatenate %188, %190, %192, %194 in 0 : vector<2x8x8xf32>, vector<2x8x8xf32>, vector<2x8x8xf32>, vector<2x8x8xf32> -> vector<8x8x8xf32>
    %196 = vector.extract_strided_slice %175 {offsets = [0, 64], sizes = [16, 32], strides = [1, 1]} : vector<16x96xf32> to vector<16x32xf32>
    %197 = vector.extract_strided_slice %196 {offsets = [0, 0], sizes = [16, 8], strides = [1, 1]} : vector<16x32xf32> to vector<16x8xf32>
    %198 = vector.shape_cast %197 : vector<16x8xf32> to vector<2x8x8xf32>
    %199 = vector.extract_strided_slice %196 {offsets = [0, 8], sizes = [16, 8], strides = [1, 1]} : vector<16x32xf32> to vector<16x8xf32>
    %200 = vector.shape_cast %199 : vector<16x8xf32> to vector<2x8x8xf32>
    %201 = vector.extract_strided_slice %196 {offsets = [0, 16], sizes = [16, 8], strides = [1, 1]} : vector<16x32xf32> to vector<16x8xf32>
    %202 = vector.shape_cast %201 : vector<16x8xf32> to vector<2x8x8xf32>
    %203 = vector.extract_strided_slice %196 {offsets = [0, 24], sizes = [16, 8], strides = [1, 1]} : vector<16x32xf32> to vector<16x8xf32>
    %204 = vector.shape_cast %203 : vector<16x8xf32> to vector<2x8x8xf32>
    %205 = tpu.concatenate %198, %200, %202, %204 in 0 : vector<2x8x8xf32>, vector<2x8x8xf32>, vector<2x8x8xf32>, vector<2x8x8xf32> -> vector<8x8x8xf32>
    %206 = arith.truncf %185 : vector<8x8x8xf32> to vector<8x8x8xbf16>
    %207 = arith.truncf %195 : vector<8x8x8xf32> to vector<8x8x8xbf16>
    "tpu.trace_start"() <{level = 10 : i32, message = "ntd,nsd->nts"}> : () -> ()
    %cst_46 = arith.constant dense<0.000000e+00> : vector<8x8x8xf32>
    %208 = tpu.matmul %206, %207, %cst_46 {dimension_numbers = #tpu.dot_dimension_numbers<[2], [2], [1], [1], [0, 0, 0, 1, 1, 1], [0], [0]>} : vector<8x8x8xbf16>, vector<8x8x8xbf16>, vector<8x8x8xf32> -> vector<8x8x8xf32>
    "tpu.trace_stop"() : () -> ()
    %cst_47 = arith.constant 0.353553385 : f32
    %209 = vector.broadcast %cst_47 : f32 to vector<8x8x8xf32>
    %210 = arith.mulf %208, %209 : vector<8x8x8xf32>
    %cst_48 = arith.constant -1.000000e+30 : f32
    %211 = vector.shape_cast %15 : vector<1x8x8xi1> to vector<1x8x8xi1>
    %212 = vector.broadcast %211 : vector<1x8x8xi1> to vector<8x8x8xi1>
    %213 = vector.broadcast %cst_48 : f32 to vector<8x8x8xf32>
    %214 = arith.select %212, %210, %213 : vector<8x8x8xi1>, vector<8x8x8xf32>
    %cst_49 = arith.constant dense<0xFF800000> : vector<8x8xf32>
    %215 = vector.multi_reduction <maximumf>, %214, %cst_49 [2] : vector<8x8x8xf32> to vector<8x8xf32>
    %216 = vector.shape_cast %215 : vector<8x8xf32> to vector<8x8x1xf32>
    %217 = vector.broadcast %216 : vector<8x8x1xf32> to vector<8x8x8xf32>
    %218 = arith.subf %214, %217 : vector<8x8x8xf32>
    %219 = math.exp %218 : vector<8x8x8xf32>
    %cst_50 = arith.constant dense<0.000000e+00> : vector<8x8xf32>
    %220 = vector.multi_reduction <add>, %219, %cst_50 [2] : vector<8x8x8xf32> to vector<8x8xf32>
    %221 = vector.shape_cast %220 : vector<8x8xf32> to vector<8x8x1xf32>
    %222 = tpu.reciprocal %221 {approx = true} : vector<8x8x1xf32> -> vector<8x8x1xf32>
    %223 = vector.broadcast %222 : vector<8x8x1xf32> to vector<8x8x8xf32>
    %224 = arith.mulf %219, %223 : vector<8x8x8xf32>
    %225 = arith.truncf %224 : vector<8x8x8xf32> to vector<8x8x8xbf16>
    %226 = arith.truncf %205 : vector<8x8x8xf32> to vector<8x8x8xbf16>
    "tpu.trace_start"() <{level = 10 : i32, message = "nts,nsd->ntd"}> : () -> ()
    %cst_51 = arith.constant dense<0.000000e+00> : vector<8x8x8xf32>
    %227 = tpu.matmul %225, %226, %cst_51 {dimension_numbers = #tpu.dot_dimension_numbers<[2], [1], [1], [2], [0, 0, 0, 1, 1, 2], [0], [0]>} : vector<8x8x8xbf16>, vector<8x8x8xbf16>, vector<8x8x8xf32> -> vector<8x8x8xf32>
    "tpu.trace_stop"() : () -> ()
    %228 = vector.extract_strided_slice %227 {offsets = [0, 0, 0], sizes = [2, 8, 8], strides = [1, 1, 1]} : vector<8x8x8xf32> to vector<2x8x8xf32>
    %229 = vector.shape_cast %228 : vector<2x8x8xf32> to vector<16x8xf32>
    %230 = vector.extract_strided_slice %227 {offsets = [2, 0, 0], sizes = [2, 8, 8], strides = [1, 1, 1]} : vector<8x8x8xf32> to vector<2x8x8xf32>
    %231 = vector.shape_cast %230 : vector<2x8x8xf32> to vector<16x8xf32>
    %232 = vector.extract_strided_slice %227 {offsets = [4, 0, 0], sizes = [2, 8, 8], strides = [1, 1, 1]} : vector<8x8x8xf32> to vector<2x8x8xf32>
    %233 = vector.shape_cast %232 : vector<2x8x8xf32> to vector<16x8xf32>
    %234 = vector.extract_strided_slice %227 {offsets = [6, 0, 0], sizes = [2, 8, 8], strides = [1, 1, 1]} : vector<8x8x8xf32> to vector<2x8x8xf32>
    %235 = vector.shape_cast %234 : vector<2x8x8xf32> to vector<16x8xf32>
    %236 = tpu.concatenate %229, %231, %233, %235 in 1 : vector<16x8xf32>, vector<16x8xf32>, vector<16x8xf32>, vector<16x8xf32> -> vector<16x32xf32>
    %c400 = arith.constant 400 : index
    %c0_52 = arith.constant 0 : index
    %237 = vector.load %arg2[%c400, %c0_52] : memref<624x128xbf16, #tpu.memory_space<vmem>>, vector<32x32xbf16>
    %c11 = arith.constant 11 : index
    %c0_53 = arith.constant 0 : index
    %238 = vector.load %arg3[%c11, %c0_53] : memref<17x128xf32, #tpu.memory_space<vmem>>, vector<1x32xf32>
    %239 = arith.truncf %236 : vector<16x32xf32> to vector<16x32xbf16>
    %cst_54 = arith.constant dense<0.000000e+00> : vector<16x32xf32>
    %240 = tpu.matmul %239, %237, %cst_54 {dimension_numbers = #tpu.dot_dimension_numbers<[1], [0], [0], [1], [0, 0, 1, 1], [], []>} : vector<16x32xbf16>, vector<32x32xbf16>, vector<16x32xf32> -> vector<16x32xf32>
    %241 = vector.broadcast %238 : vector<1x32xf32> to vector<16x32xf32>
    %242 = arith.addf %240, %241 : vector<16x32xf32>
    %243 = arith.addf %148, %242 : vector<16x32xf32>
    %c9 = arith.constant 9 : index
    %c0_55 = arith.constant 0 : index
    %244 = vector.load %arg3[%c9, %c0_55] : memref<17x128xf32, #tpu.memory_space<vmem>>, vector<1x32xf32>
    %c10 = arith.constant 10 : index
    %c0_56 = arith.constant 0 : index
    %245 = vector.load %arg3[%c10, %c0_56] : memref<17x128xf32, #tpu.memory_space<vmem>>, vector<1x32xf32>
    %cst_57 = arith.constant dense<0.000000e+00> : vector<16xf32>
    %246 = vector.multi_reduction <add>, %243, %cst_57 [1] : vector<16x32xf32> to vector<16xf32>
    %247 = vector.shape_cast %246 : vector<16xf32> to vector<16x1xf32>
    %cst_58 = arith.constant 3.200000e+01 : f32
    %248 = vector.broadcast %cst_58 : f32 to vector<16x1xf32>
    %249 = arith.divf %247, %248 : vector<16x1xf32>
    %250 = vector.broadcast %249 : vector<16x1xf32> to vector<16x32xf32>
    %251 = arith.subf %243, %250 : vector<16x32xf32>
    %252 = arith.mulf %251, %251 : vector<16x32xf32>
    %cst_59 = arith.constant dense<0.000000e+00> : vector<16xf32>
    %253 = vector.multi_reduction <add>, %252, %cst_59 [1] : vector<16x32xf32> to vector<16xf32>
    %254 = vector.shape_cast %253 : vector<16xf32> to vector<16x1xf32>
    %cst_60 = arith.constant 3.200000e+01 : f32
    %255 = vector.broadcast %cst_60 : f32 to vector<16x1xf32>
    %256 = arith.divf %254, %255 : vector<16x1xf32>
    %257 = vector.broadcast %249 : vector<16x1xf32> to vector<16x32xf32>
    %258 = arith.subf %243, %257 : vector<16x32xf32>
    %cst_61 = arith.constant 9.99999974E-6 : f32
    %259 = vector.broadcast %cst_61 : f32 to vector<16x1xf32>
    %260 = arith.addf %256, %259 : vector<16x1xf32>
    %261 = math.rsqrt %260 : vector<16x1xf32>
    %262 = vector.broadcast %261 : vector<16x1xf32> to vector<16x32xf32>
    %263 = arith.mulf %258, %262 : vector<16x32xf32>
    %264 = vector.broadcast %244 : vector<1x32xf32> to vector<16x32xf32>
    %265 = arith.mulf %263, %264 : vector<16x32xf32>
    %266 = vector.broadcast %245 : vector<1x32xf32> to vector<16x32xf32>
    %267 = arith.addf %265, %266 : vector<16x32xf32>
    %c432 = arith.constant 432 : index
    %c0_62 = arith.constant 0 : index
    %268 = vector.load %arg2[%c432, %c0_62] : memref<624x128xbf16, #tpu.memory_space<vmem>>, vector<32x128xbf16>
    %c12 = arith.constant 12 : index
    %c0_63 = arith.constant 0 : index
    %269 = vector.load %arg3[%c12, %c0_63] : memref<17x128xf32, #tpu.memory_space<vmem>>, vector<1x128xf32>
    %c464 = arith.constant 464 : index
    %c0_64 = arith.constant 0 : index
    %270 = vector.load %arg2[%c464, %c0_64] : memref<624x128xbf16, #tpu.memory_space<vmem>>, vector<128x32xbf16>
    %c13 = arith.constant 13 : index
    %c0_65 = arith.constant 0 : index
    %271 = vector.load %arg3[%c13, %c0_65] : memref<17x128xf32, #tpu.memory_space<vmem>>, vector<1x32xf32>
    %272 = arith.truncf %267 : vector<16x32xf32> to vector<16x32xbf16>
    %cst_66 = arith.constant dense<0.000000e+00> : vector<16x128xf32>
    %273 = tpu.matmul %272, %268, %cst_66 {dimension_numbers = #tpu.dot_dimension_numbers<[1], [0], [0], [1], [0, 0, 1, 1], [], []>} : vector<16x32xbf16>, vector<32x128xbf16>, vector<16x128xf32> -> vector<16x128xf32>
    %274 = vector.broadcast %269 : vector<1x128xf32> to vector<16x128xf32>
    %275 = arith.addf %273, %274 : vector<16x128xf32>
    %cst_67 = arith.constant 0.000000e+00 : f32
    %276 = vector.broadcast %cst_67 : f32 to vector<16x128xf32>
    %277 = arith.maximumf %275, %276 : vector<16x128xf32>
    %278 = arith.truncf %277 : vector<16x128xf32> to vector<16x128xbf16>
    %cst_68 = arith.constant dense<0.000000e+00> : vector<16x32xf32>
    %279 = tpu.matmul %278, %270, %cst_68 {dimension_numbers = #tpu.dot_dimension_numbers<[1], [0], [0], [1], [0, 0, 1, 1], [], []>} : vector<16x128xbf16>, vector<128x32xbf16>, vector<16x32xf32> -> vector<16x32xf32>
    %280 = vector.broadcast %271 : vector<1x32xf32> to vector<16x32xf32>
    %281 = arith.addf %279, %280 : vector<16x32xf32>
    %c14 = arith.constant 14 : index
    %c0_69 = arith.constant 0 : index
    %282 = vector.load %arg3[%c14, %c0_69] : memref<17x128xf32, #tpu.memory_space<vmem>>, vector<1x32xf32>
    %c15 = arith.constant 15 : index
    %c0_70 = arith.constant 0 : index
    %283 = vector.load %arg3[%c15, %c0_70] : memref<17x128xf32, #tpu.memory_space<vmem>>, vector<1x32xf32>
    %cst_71 = arith.constant dense<0.000000e+00> : vector<16xf32>
    %284 = vector.multi_reduction <add>, %281, %cst_71 [1] : vector<16x32xf32> to vector<16xf32>
    %285 = vector.shape_cast %284 : vector<16xf32> to vector<16x1xf32>
    %cst_72 = arith.constant 3.200000e+01 : f32
    %286 = vector.broadcast %cst_72 : f32 to vector<16x1xf32>
    %287 = arith.divf %285, %286 : vector<16x1xf32>
    %288 = vector.broadcast %287 : vector<16x1xf32> to vector<16x32xf32>
    %289 = arith.subf %281, %288 : vector<16x32xf32>
    %290 = arith.mulf %289, %289 : vector<16x32xf32>
    %cst_73 = arith.constant dense<0.000000e+00> : vector<16xf32>
    %291 = vector.multi_reduction <add>, %290, %cst_73 [1] : vector<16x32xf32> to vector<16xf32>
    %292 = vector.shape_cast %291 : vector<16xf32> to vector<16x1xf32>
    %cst_74 = arith.constant 3.200000e+01 : f32
    %293 = vector.broadcast %cst_74 : f32 to vector<16x1xf32>
    %294 = arith.divf %292, %293 : vector<16x1xf32>
    %295 = vector.broadcast %287 : vector<16x1xf32> to vector<16x32xf32>
    %296 = arith.subf %281, %295 : vector<16x32xf32>
    %cst_75 = arith.constant 9.99999974E-6 : f32
    %297 = vector.broadcast %cst_75 : f32 to vector<16x1xf32>
    %298 = arith.addf %294, %297 : vector<16x1xf32>
    %299 = math.rsqrt %298 : vector<16x1xf32>
    %300 = vector.broadcast %299 : vector<16x1xf32> to vector<16x32xf32>
    %301 = arith.mulf %296, %300 : vector<16x32xf32>
    %302 = vector.broadcast %282 : vector<1x32xf32> to vector<16x32xf32>
    %303 = arith.mulf %301, %302 : vector<16x32xf32>
    %304 = vector.broadcast %283 : vector<1x32xf32> to vector<16x32xf32>
    %305 = arith.addf %303, %304 : vector<16x32xf32>
    %c592 = arith.constant 592 : index
    %c0_76 = arith.constant 0 : index
    %306 = vector.load %arg2[%c592, %c0_76] : memref<624x128xbf16, #tpu.memory_space<vmem>>, vector<32x128xbf16>
    %c16 = arith.constant 16 : index
    %c0_77 = arith.constant 0 : index
    %307 = vector.load %arg3[%c16, %c0_77] : memref<17x128xf32, #tpu.memory_space<vmem>>, vector<1x128xf32>
    %308 = arith.truncf %305 : vector<16x32xf32> to vector<16x32xbf16>
    %cst_78 = arith.constant dense<0.000000e+00> : vector<16x128xf32>
    %309 = tpu.matmul %308, %306, %cst_78 {dimension_numbers = #tpu.dot_dimension_numbers<[1], [0], [0], [1], [0, 0, 1, 1], [], []>} : vector<16x32xbf16>, vector<32x128xbf16>, vector<16x128xf32> -> vector<16x128xf32>
    %310 = vector.broadcast %307 : vector<1x128xf32> to vector<16x128xf32>
    %311 = arith.addf %309, %310 : vector<16x128xf32>
    %c0_79 = arith.constant 0 : index
    %c0_80 = arith.constant 0 : index
    %312 = vector.load %arg4[%c0_79, %c0_80] : memref<16x128xf32, #tpu.memory_space<vmem>>, vector<16x128xf32>
    tpu.vector_store %arg4[%c0_79, %c0_80], %311 {strides = array<i32>} : memref<16x128xf32, #tpu.memory_space<vmem>>, vector<16x128xf32>,
    return
  }
  func.func @transform_0(%arg0: i32) -> (i32, i32) {
    %c0_i32 = arith.constant 0 : i32
    %c0_i32_0 = arith.constant 0 : i32
    %c0_i32_1 = arith.constant 0 : i32
    return %c0_i32, %c0_i32_0 : i32, i32
  }
  func.func @transform_1(%arg0: i32) -> (i32, i32) {
    %c0_i32 = arith.constant 0 : i32
    %c0_i32_0 = arith.constant 0 : i32
    %c0_i32_1 = arith.constant 0 : i32
    return %c0_i32, %c0_i32_0 : i32, i32
  }
  func.func @transform_2(%arg0: i32) -> (i32, i32) {
    %c0_i32 = arith.constant 0 : i32
    %c0_i32_0 = arith.constant 0 : i32
    %c0_i32_1 = arith.constant 0 : i32
    return %c0_i32, %c0_i32_0 : i32, i32
  }
  func.func @transform_3(%arg0: i32) -> (i32, i32) {
    %c0_i32 = arith.constant 0 : i32
    %c0_i32_0 = arith.constant 0 : i32
    %c0_i32_1 = arith.constant 0 : i32
    return %c0_i32, %c0_i32_0 : i32, i32
  }
}

</mosaic_0001>

<bundles_post_ra>
// kernel: forward_pallas.1
= control target key start
LH: loop header
LB: loop body
LE: loop exit
PB: predicated region body
PF: predicated region fallthrough
CT: control target
= control target key end

     0   :  { %8 = vsyncpa [#allocation3], 0  ;;  %s2742_s0 = inlined_call_operand.vmem [shape: s32[16,1], index: 0, kind: input, shape index: {}]   ;;  %s2743_s1 = inlined_call_operand.hbm [shape: bf16[624,128], index: 1, kind: input, shape index: {}]   ;;  %s2744_s2 = inlined_call_operand.hbm [shape: f32[17,128], index: 2, kind: input, shape index: {}]   ;;  %s2745_s3 = inlined_call_operand.vmem [shape: f32[16,128], index: 3, kind: output, shape index: {}]  }
   0x1   :  { %s16_s14 = sshll.u32 %s2743_s1, 4  ;;  %s17_s14 = int_to_ptr.hbm [resolvable:$true] %s16_s14 }
   0x2   :  { %9 = vsyncpa [#allocation5], 0  ;;  %s2353_s15 = smov [#allocation2]   ;;  %s29_s19 = sshll.u32 %s2744_s2, 4  ;;  %s30_s19 = int_to_ptr.hbm [resolvable:$true] %s29_s19 }
   0x3   :  { %s18_s16 = sshll.u32 %s2353_s15, 4  ;;  %s2354_s20 = smov 64   ;;  %s19_s16 = int_to_ptr.vmem [resolvable:$true] %s18_s16 }
   0x4   :  { %s2355_s21 = smov 4   ;;  %s2356_s22 = smov [#allocation4]  }
   0x5   :  { %24 = dma.hbm_to_vmem [thread:$0]  %s17_s14, 4992, %s19_s16, [#allocation3], %s2354_s20, %s2354_s20, %s2355_s21  }
   0x6   :  { %s31_s23 = sshll.u32 %s2356_s22, 4  ;;  %s2357_s24 = smov 128   ;;  %s32_s23 = int_to_ptr.vmem [resolvable:$true] %s31_s23 }
   0x7   :  { %s2358_s1 = smov 8  }
   0x8   :  { %37 = dma.hbm_to_vmem [thread:$0]  %s30_s19, 384, %s32_s23, [#allocation5], %s2357_s24, %s2357_s24, %s2358_s1  }
   0x9   :  { %2349 = dma.done.wait [#allocation3], 4992  }
   0xa   :  { %2350 = vsyncadd [#allocation3], 4294962304 }
   0xb   :  { %2351 = dma.done.wait [#allocation5], 384  }
   0xc   :  { %2352 = vsyncadd [#allocation5], 4294966912  ;;  %v2359_v0 = vmov 0   ;;  %v47_v1 = vld [vmem:[%s2742_s0] sm:$0xff]  ;;  %v2111_v2 = vld [vmem:[#allocation2 + $0x38] sm:$0xff]  ;;  %v49_v12 = vlaneseq  ;;  %vm151_vm3 = vcmask 261120  }
   0xd   :  { %2162 = vset.pattern.permute.xlu0 %v2359_v0  ;;  %132 = vmatpush.bf16.msra.mxu0 %v2111_v2  ;;  %v2110_v3 = vld [vmem:[#allocation2 + $0x30] sm:$0xff]  ;;  %v48_v4 = vld [vmem:[%s2742_s0 + $0x8] sm:$0xff]  ;;  %v2108_v6 = vld [vmem:[#allocation2 + $0x20] sm:$0xff]  ;;  %v2360_v15 = vmov 1.0|1.0   ;;  %v2361_v25 = vmov 32.0  }
   0xe   :  { %52 = vperm.xlu0 %2162, %v47_v1   ;;  %v2109_v5 = vld [vmem:[#allocation2 + $0x28] sm:$0xff]  ;;  %v2107_v7 = vld [vmem:[#allocation2 + $0x18] sm:$0xff]  ;;  %v2106_v8 = vld [vmem:[#allocation2 + $0x10] sm:$0xff]  ;;  %v2404_v13 = vand.u32 127, %v49_v12  ;;  %2215 = vrcp.f32 %v2361_v25  ;;  %s2362_s0 = smov 120   ;;  %s2363_s28 = smov 112  }
   0xf   :  { %v2105_v9 = vld [vmem:[#allocation2 + $0x8] sm:$0xff]  ;;  %v2104_v10 = vld [vmem:[#allocation2] sm:$0xff]  ;;  %v2113_v42 = vld [vmem:[#allocation2 + $0x50] sm:$0xff]  ;;  %s2364_s29 = smov 96   ;;  %s2365_s30 = smov 104   ;;  %vm276_vm11 = vcmask 64512  }
  0x10   :  { %v2146_v16 = vld [vmem:[#allocation2 + $0x40] sm:$0xff]   ;;  %235 = vmatpush.bf16.msra.mxu1 %v2113_v42  ;;  %v2112_v44 = vld [vmem:[#allocation2 + $0x48] sm:$0xff]  ;;  %v2198_v63 = vld [vmem:[#allocation4] ss:$0 sm:$0xff]  ;;  %vm583_vm13 = vcmask 1043456   ;;  %s2366_s4 = smov 24  }
  0x11   :  { %133 = vmatpush.bf16.msra.mxu0 %v2110_v3  ;;  %v2144_v17 = vunpack.c.l.bf16 %v2146_v16  ;;  %v2145_v21 = vunpack.c.h.bf16 %v2146_v16  ;;  %s2367_s5 = smov 16   ;;  %vm773_vm14 = vcmask 130048   ;;  %vm776_vm15 = vcmask 195584  }
  0x14   :  { %v2216_v26 = vpop.eup %2215  ;;  %236 = vmatpush.bf16.msra.mxu1 %v2112_v44 }
  0x15   :  { %134 = vmatpush.bf16.msra.mxu0 %v2109_v5  ;;  %v159_v27 = vmul.f32 32.0, %v2216_v26  ;;  %vm163_vm4 = vweird.f32 %v2216_v26 }
  0x16   :  { %55 = vperm.xlu0 %2162, %v48_v4   ;;  %v2199_v4 = vld [vmem:[#allocation4 + $0x1] ss:$0 sm:$0xff] }
  0x17   :  { %v160_v28 = vsub.f32 1.0, %v159_v27 }
  0x19   :  { %135 = vmatpush.bf16.msra.mxu0 %v2108_v6  ;;  %v161_v29 = vmul.f32 %v2216_v26, %v160_v28 }
  0x1b   :  { %v162_v30 = vadd.f32 %v2216_v26, %v161_v29 }
  0x1d   :  { %136 = vmatpush.bf16.msra.mxu0 %v2107_v7  ;;  %v2416_v31 = vsel %vm163_vm4, %v2216_v26, %v162_v30 }
  0x21   :  { %137 = vmatpush.bf16.msra.mxu0 %v2106_v8 }
  0x25   :  { %138 = vmatpush.bf16.msra.mxu0 %v2105_v9 }
  0x29   :  { %139 = vmatpush.bf16.msra.mxu0 %v2104_v10 }
  0x80   :  { %v53_v11 = vpop.permute.xlu0 %52 }
  0x81   :  { %vm57_vm0 = vcmp.eq.s32.totalorder %v2404_v13, %v53_v11 }
  0x88   :  { %v56_v14 = vpop.permute.xlu0 %55 }
  0x89   :  { %vm58_vm1 = vcmp.eq.s32.totalorder %v2404_v13, %v56_v14 }
  0x8a   :  { %vm1943_vm2 = vmpackc.low %vm58_vm1, %vm57_vm0 }
  0x8b   :  { %1944 = vmatmul.msk.bf16.vlgmr.msra.gmra.mxu0 %vm1943_vm2, %v2360_v15 }
 0x108   :  { %v141_v18 = vpop.f32.mrf.mxu0 }
 0x109   :  { %v2408_v19 = vadd.f32 %v2144_v17, %v141_v18 }
 0x10b   :  { %v152_v20 = vsel %vm151_vm3, %v2408_v19, 0.0 }
 0x10c   :  { %153 = vadd.xlane.f32.xlu1 %v152_v20 }
 0x110   :  { %v143_v22 = vpop.f32.mrf.mxu0 }
 0x111   :  { %v2412_v23 = vadd.f32 %v2145_v21, %v143_v22 }
 0x113   :  { %v155_v24 = vsel %vm151_vm3, %v2412_v23, 0.0 }
 0x114   :  { %156 = vadd.xlane.f32.xlu1 %v155_v24 }
 0x17f   :  { %v154_v32 = vpop.xlane.xlu1 %153 }
 0x180   :  { %v165_v33 = vmul.f32 %v2416_v31, %v154_v32 }
 0x182   :  { %v167_v34 = vsub.f32 %v2408_v19, %v165_v33 }
 0x184   :  { %v169_v35 = vmul.f32 %v167_v34, %v167_v34 }
 0x186   :  { %v171_v36 = vsel %vm151_vm3, %v169_v35, 0.0 }
 0x187   :  { %172 = vadd.xlane.f32.xlu2 %v171_v36  ;;  %v157_v37 = vpop.xlane.xlu1 %156 }
 0x188   :  { %v166_v38 = vmul.f32 %v2416_v31, %v157_v37 }
 0x18a   :  { %v168_v39 = vsub.f32 %v2412_v23, %v166_v38 }
 0x18c   :  { %v170_v40 = vmul.f32 %v168_v39, %v168_v39 }
 0x18e   :  { %v174_v41 = vsel %vm151_vm3, %v170_v40, 0.0 }
 0x18f   :  { %175 = vadd.xlane.f32.xlu2 %v174_v41 }
 0x1fa   :  { %v173_v43 = vpop.xlane.xlu2 %172 }
 0x1fb   :  { %v177_v45 = vmul.f32 %v173_v43, %v2416_v31 }
 0x1fd   :  { %v179_v46 = vadd.f32 1e-05, %v177_v45 }
 0x1ff   :  { %2217 = vrsqrt.f32 %v179_v46  ;;  %vm187_vm6 = vweird.f32 %v179_v46 }
 0x202   :  { %v176_v47 = vpop.xlane.xlu2 %175 }
 0x203   :  { %v178_v48 = vmul.f32 %v176_v47, %v2416_v31 }
 0x205   :  { %v2218_v49 = vpop.eup %2217  ;;  %v180_v50 = vadd.f32 1e-05, %v178_v48 }
 0x206   :  { %v182_v51 = vmul.f32 %v2218_v49, %v179_v46  ;;  %vm188_vm5 = vweird.f32 %v2218_v49 }
 0x207   :  { %2219 = vrsqrt.f32 %v180_v50  ;;  %vm189_vm7 = vmor %vm187_vm6, %vm188_vm5  ;;  %vm197_vm9 = vweird.f32 %v180_v50 }
 0x208   :  { %v183_v52 = vmul.f32 %v2218_v49, %v182_v51 }
 0x20a   :  { %v184_v53 = vmul.f32 0.5, %v183_v52 }
 0x20c   :  { %v185_v54 = vsub.f32 1.5, %v184_v53 }
 0x20d   :  { %v2220_v55 = vpop.eup %2219 }
 0x20e   :  { %v186_v56 = vmul.f32 %v2218_v49, %v185_v54  ;;  %v192_v57 = vmul.f32 %v2220_v55, %v180_v50  ;;  %vm198_vm8 = vweird.f32 %v2220_v55 }
 0x20f   :  { %vm199_vm10 = vmor %vm197_vm9, %vm198_vm8 }
 0x210   :  { %v193_v58 = vmul.f32 %v2220_v55, %v192_v57  ;;  %v190_v59 = vsel %vm189_vm7, %v2218_v49, %v186_v56 }
 0x211   :  { %v201_v62 = vmul.f32 %v190_v59, %v167_v34 }
 0x212   :  { %v194_v60 = vmul.f32 0.5, %v193_v58  ;;  %v147_v58 = vshrl.u32 %v49_v12, 7 }
 0x213   :  { %v204_v3 = vmul.f32 %v2198_v63, %v201_v62 }
 0x214   :  { %v195_v61 = vsub.f32 1.5, %v194_v60  ;;  %vm2468_vm12 = vcmp.le.s32.totalorder %v2404_v13, %v147_v58 }
 0x215   :  { %v207_v6 = vadd.f32 %v2199_v4, %v204_v3 }
 0x216   :  { %v196_v0 = vmul.f32 %v2220_v55, %v195_v61 }
 0x218   :  { %v200_v1 = vsel %vm199_vm10, %v2220_v55, %v196_v0 }
 0x219   :  { %v202_v2 = vmul.f32 %v200_v1, %v168_v39 }
 0x21b   :  { %v205_v5 = vmul.f32 %v2198_v63, %v202_v2 }
 0x21d   :  { %v208_v7 = vadd.f32 %v2199_v4, %v205_v5 }
 0x21f   :  { %v213_v8 = vpack.c.bf16 %v208_v7, %v207_v6 }
 0x221   :  { %1953 = vmatmul.msk.bf16.vlgmr.msra.gmra.mxu1 %vm151_vm3, %v213_v8 }
 0x29e   :  { %v238_v9 = vpop.f32.mrf.mxu1 }
 0x29f   :  { %245 = vrot.lane.b32.xlu2 %v238_v9, %s2362_s0  ;;  %251 = vrot.lane.b32.xlu1 %v238_v9, %s2363_s28  ;;  %v263_v17 = vpack.c.bf16 %v238_v9, %v238_v9 }
 0x2a1   :  { %v272_v18 = vunpack.c.l.b16 %v263_v17 }
 0x2a3   :  { %v273_v20 = vpack.c.b16 %v272_v18, %v272_v18 }
 0x2a6   :  { %v240_v10 = vpop.f32.mrf.mxu1 }
 0x2a7   :  { %v264_v11 = vpack.c.bf16 %v240_v10, %v240_v10  ;;  %247 = vrot.lane.b32.xlu0 %v240_v10, %s2362_s0  ;;  %v2163_v16 = vpack.i.bf16 %v240_v10, %v238_v9 }
 0x2a9   :  { %v297_v14 = vunpack.c.l.b16 %v264_v11 }
 0x2ab   :  { %v2430_v15 = vpack.c.b16 %v297_v14, %v297_v14 }
 0x2ad   :  { %299 = vrot.lane.b32.xlu2 %v2430_v15, %s2364_s29 }
 0x2af   :  { %2164 = vrot.lane.b32.xlu0 %v2163_v16, %s2365_s30 }
 0x2b7   :  { %253 = vrot.lane.b32.xlu0 %v240_v10, %s2363_s28 }
 0x2bf   :  { %274 = vrot.lane.b32.xlu0 %v273_v20, %s2364_s29 }
 0x2f9   :  { %v246_v21 = vpop.permute.xlu2 %245 }
 0x2fa   :  { %v265_v22 = vpack.c.bf16 %v246_v21, %v246_v21 }
 0x2fc   :  { %v321_v24 = vunpack.c.l.b16 %v265_v22 }
 0x2fe   :  { %v322_v25 = vpack.c.b16 %v321_v24, %v321_v24 }
 0x300   :  { %323 = vrot.lane.b32.xlu2 %v322_v25, %s2364_s29 }
 0x307   :  { %v300_v26 = vpop.permute.xlu2 %299 }
 0x308   :  { %v305_v27 = vsel %vm276_vm11, %v300_v26, 0 }
 0x309   :  { %314 = vmatpush.bf16.xpose.msra.mxu3 %v305_v27 }
 0x310   :  { %1955 = vmatmul.msk.bf16.vlgmr.msra.gmra.mxu3 %vm276_vm11, %v264_v11 }
 0x311   :  { %v252_v28 = vpop.permute.xlu1 %251 }
 0x312   :  { %v267_v29 = vpack.c.bf16 %v252_v28, %v252_v28 }
 0x314   :  { %v369_v30 = vunpack.c.l.b16 %v267_v29 }
 0x316   :  { %v2440_v32 = vpack.c.b16 %v369_v30, %v369_v30 }
 0x318   :  { %371 = vrot.lane.b32.xlu0 %v2440_v32, %s2364_s29 }
 0x319   :  { %v248_v33 = vpop.permute.xlu0 %247 }
 0x31a   :  { %v266_v34 = vpack.c.bf16 %v248_v33, %v248_v33 }
 0x31c   :  { %v345_v35 = vunpack.c.l.b16 %v266_v34 }
 0x31e   :  { %v346_v36 = vpack.c.b16 %v345_v35, %v345_v35 }
 0x320   :  { %347 = vrot.lane.b32.xlu1 %v346_v36, %s2364_s29 }
 0x321   :  { %v2165_v37 = vpop.permute.xlu0 %2164 }
 0x322   :  { %v2167_v38 = vunpack.i.h.bf16 %v2165_v37  ;;  %v2166_v39 = vunpack.i.l.bf16 %v2165_v37 }
 0x324   :  { %v270_v40 = vpack.c.bf16 %v2167_v38, %v2167_v38  ;;  %v269_v41 = vpack.c.bf16 %v2166_v39, %v2166_v39 }
 0x326   :  { %v441_v42 = vunpack.c.l.b16 %v270_v40  ;;  %v417_v43 = vunpack.c.l.b16 %v269_v41 }
 0x328   :  { %v2445_v44 = vpack.c.b16 %v441_v42, %v441_v42  ;;  %v2447_v45 = vpack.c.b16 %v417_v43, %v417_v43 }
 0x329   :  { %v254_v46 = vpop.permute.xlu0 %253 }
 0x32a   :  { %v268_v47 = vpack.c.bf16 %v254_v46, %v254_v46  ;;  %443 = vrot.lane.b32.xlu0 %v2445_v44, %s2364_s29  ;;  %419 = vrot.lane.b32.xlu1 %v2447_v45, %s2364_s29 }
 0x32c   :  { %v393_v48 = vunpack.c.l.b16 %v268_v47 }
 0x32e   :  { %v2453_v49 = vpack.c.b16 %v393_v48, %v393_v48 }
 0x330   :  { %395 = vrot.lane.b32.xlu2 %v2453_v49, %s2364_s29 }
 0x331   :  { %v275_v50 = vpop.permute.xlu0 %274 }
 0x332   :  { %578 = vrot.lane.b32.xlu0 %v273_v20, %s2354_s20  ;;  %621 = vrot.lane.b32.xlu1 %v322_v25, %s2354_s20  ;;  %v281_v51 = vsel %vm276_vm11, %v275_v50, 0 }
 0x333   :  { %290 = vmatpush.bf16.xpose.msra.mxu2 %v281_v51 }
 0x338   :  { %642 = vrot.lane.b32.xlu2 %v346_v36, %s2354_s20 }
 0x33a   :  { %1954 = vmatmul.msk.bf16.vlgmr.msra.gmra.mxu2 %vm276_vm11, %v263_v17 }
 0x35a   :  { %v324_v52 = vpop.permute.xlu2 %323 }
 0x35b   :  { %v329_v53 = vsel %vm276_vm11, %v324_v52, 0 }
 0x35c   :  { %338 = vmatpush.bf16.xpose.msrb.mxu1 %v329_v53 }
 0x363   :  { %1956 = vmatmul.msk.bf16.vlgmr.msrb.gmra.mxu1 %vm276_vm11, %v265_v22 }
 0x38a   :  { %v372_v54 = vpop.permute.xlu0 %371  ;;  %v396_v55 = vpop.permute.xlu2 %395 }
 0x38b   :  { %v401_v56 = vsel %vm276_vm11, %v396_v55, 0  ;;  %v377_v57 = vsel %vm276_vm11, %v372_v54, 0 }
 0x38c   :  { %386 = vmatpush.bf16.xpose.msrb.mxu3 %v377_v57  ;;  %410 = vmatpush.bf16.xpose.msra.mxu1 %v401_v56 }
 0x392   :  { %v348_v59 = vpop.permute.xlu1 %347  ;;  %v643_v13 = vpop.permute.xlu2 %642 }
 0x393   :  { %v316_v61 = vpop.f32.mrf.mxu3  ;;  %1958 = vmatmul.msk.bf16.vlgmr.msrb.gmra.mxu3 %vm276_vm11, %v267_v29  ;;  %1959 = vmatmul.msk.bf16.vlgmr.msra.gmra.mxu1 %vm276_vm11, %v268_v47  ;;  %v353_v62 = vsel %vm276_vm11, %v348_v59, 0  ;;  %v648_v6 = vsel %vm583_vm13, %v643_v13, 0 }
 0x394   :  { %v465_v63 = vmul.f32 0.35355338, %v316_v61  ;;  %362 = vmatpush.bf16.xpose.msrb.mxu2 %v353_v62 }
 0x396   :  { %v475_v0 = vsel %vm2468_vm12, %v465_v63, -1e+30 }
 0x397   :  { %v485_v12 = vsel %vm276_vm11, %v475_v0, -inf }
 0x398   :  { %486 = vmax.xlane.f32.xlu1 %v485_v12 }
 0x39b   :  { %v318_v1 = vpop.f32.mrf.mxu3  ;;  %1957 = vmatmul.msk.bf16.vlgmr.msrb.gmra.mxu2 %vm276_vm11, %v266_v34 }
 0x39c   :  { %v444_v2 = vpop.permute.xlu0 %443  ;;  %v420_v3 = vpop.permute.xlu1 %419 }
 0x39d   :  { %v449_v4 = vsel %vm276_vm11, %v444_v2, 0  ;;  %v425_v5 = vsel %vm276_vm11, %v420_v3, 0 }
 0x39e   :  { %434 = vmatpush.bf16.xpose.msra.mxu2 %v425_v5  ;;  %458 = vmatpush.bf16.xpose.msra.mxu3 %v449_v4 }
 0x3a4   :  { %v579_v7 = vpop.permute.xlu0 %578  ;;  %v622_v8 = vpop.permute.xlu1 %621 }
 0x3a5   :  { %v627_v9 = vsel %vm583_vm13, %v622_v8, 0  ;;  %1961 = vmatmul.msk.bf16.vlgmr.msra.gmra.mxu3 %vm276_vm11, %v270_v40  ;;  %v585_v10 = vsel %vm583_vm13, %v579_v7, 0 }
 0x3a6   :  { %657 = vmatpush.bf16.msrb.mxu3 %v648_v6  ;;  %594 = vmatpush.bf16.msrb.mxu0 %v585_v10 }
 0x3a7   :  { %636 = vmatpush.bf16.msrb.mxu2 %v627_v9 }
 0x3ab   :  { %1960 = vmatmul.msk.bf16.vlgmr.msra.gmra.mxu2 %vm276_vm11, %v269_v41 }
 0x3bd   :  { %v292_v11 = vpop.f32.mrf.mxu2 }
 0x3be   :  { %v464_v14 = vmul.f32 0.35355338, %v292_v11 }
 0x3c0   :  { %v474_v16 = vsel %vm2468_vm12, %v464_v14, -1e+30 }
 0x3c1   :  { %v482_v17 = vsel %vm276_vm11, %v474_v16, -inf }
 0x3c2   :  { %483 = vmax.xlane.f32.xlu2 %v482_v17 }
 0x3c5   :  { %v294_v18 = vpop.f32.mrf.mxu2 }
 0x3e0   :  { %v340_v20 = vpop.f32.mrf.mxu1 }
 0x3e1   :  { %v466_v21 = vmul.f32 0.35355338, %v340_v20 }
 0x3e3   :  { %v476_v22 = vsel %vm2468_vm12, %v466_v21, -1e+30 }
 0x3e4   :  { %v488_v24 = vsel %vm276_vm11, %v476_v22, -inf }
 0x3e5   :  { %489 = vmax.xlane.f32.xlu1 %v488_v24 }
 0x3e8   :  { %v342_v25 = vpop.f32.mrf.mxu1 }
 0x3fe   :  { %600 = vrot.lane.b32.xlu1 %v2430_v15, %s2354_s20 }
 0x40b   :  { %v487_v37 = vpop.xlane.xlu1 %486 }
 0x40c   :  { %v507_v40 = vsub.f32 %v475_v0, %v487_v37 }
 0x40e   :  { %v516_v43 = vmul.f32 1.442695, %v507_v40 }
 0x410   :  { %v412_v26 = vpop.f32.mrf.mxu1  ;;  %2221 = vpow2.f32 %v516_v43 }
 0x411   :  { %v469_v27 = vmul.f32 0.35355338, %v412_v26 }
 0x413   :  { %v479_v28 = vsel %vm2468_vm12, %v469_v27, -1e+30 }
 0x414   :  { %v497_v29 = vsel %vm276_vm11, %v479_v28, -inf }
 0x415   :  { %498 = vmax.xlane.f32.xlu2 %v497_v29 }
 0x416   :  { %v388_v30 = vpop.f32.mrf.mxu3  ;;  %v2222_v54 = vpop.eup %2221 }
 0x417   :  { %v468_v38 = vmul.f32 0.35355338, %v388_v30  ;;  %v533_v55 = vsel %vm276_vm11, %v2222_v54, 0.0 }
 0x418   :  { %v414_v33 = vpop.f32.mrf.mxu1 }
 0x419   :  { %v478_v41 = vsel %vm2468_vm12, %v468_v38, -1e+30 }
 0x41a   :  { %v494_v46 = vsel %vm276_vm11, %v478_v41, -inf }
 0x41e   :  { %v364_v34 = vpop.f32.mrf.mxu2  ;;  %v390_v35 = vpop.f32.mrf.mxu3 }
 0x41f   :  { %v467_v36 = vmul.f32 0.35355338, %v364_v34 }
 0x421   :  { %v477_v39 = vsel %vm2468_vm12, %v467_v36, -1e+30 }
 0x422   :  { %v491_v15 = vsel %vm276_vm11, %v477_v39, -inf }
 0x423   :  { %492 = vmax.xlane.f32.xlu0 %v491_v15 }
 0x426   :  { %v366_v42 = vpop.f32.mrf.mxu2 }
 0x428   :  { %v460_v47 = vpop.f32.mrf.mxu3  ;;  %495 = vmax.xlane.f32.xlu1 %v494_v46 }
 0x429   :  { %v471_v48 = vmul.f32 0.35355338, %v460_v47 }
 0x42b   :  { %v481_v50 = vsel %vm2468_vm12, %v471_v48, -1e+30 }
 0x42c   :  { %v503_v51 = vsel %vm276_vm11, %v481_v50, -inf }
 0x42d   :  { %504 = vmax.xlane.f32.xlu0 %v503_v51 }
 0x42e   :  { %v436_v52 = vpop.f32.mrf.mxu2 }
 0x42f   :  { %v470_v63 = vmul.f32 0.35355338, %v436_v52 }
 0x430   :  { %v462_v53 = vpop.f32.mrf.mxu3 }
 0x431   :  { %v480_v0 = vsel %vm2468_vm12, %v470_v63, -1e+30 }
 0x432   :  { %v500_v12 = vsel %vm276_vm11, %v480_v0, -inf }
 0x435   :  { %534 = vadd.xlane.f32.xlu0 %v533_v55  ;;  %v484_v56 = vpop.xlane.xlu2 %483 }
 0x436   :  { %v506_v57 = vsub.f32 %v474_v16, %v484_v56  ;;  %v438_v58 = vpop.f32.mrf.mxu2 }
 0x438   :  { %v514_v59 = vmul.f32 1.442695, %v506_v57 }
 0x43a   :  { %2223 = vpow2.f32 %v514_v59 }
 0x440   :  { %v2224_v61 = vpop.eup %2223 }
 0x441   :  { %v530_v62 = vsel %vm276_vm11, %v2224_v61, 0.0 }
 0x442   :  { %531 = vadd.xlane.f32.xlu2 %v530_v62 }
 0x44a   :  { %501 = vmax.xlane.f32.xlu2 %v500_v12 }
 0x458   :  { %v490_v13 = vpop.xlane.xlu1 %489 }
 0x459   :  { %v508_v1 = vsub.f32 %v476_v22, %v490_v13 }
 0x45b   :  { %v518_v2 = vmul.f32 1.442695, %v508_v1 }
 0x45d   :  { %2225 = vpow2.f32 %v518_v2 }
 0x462   :  { %705 = vrot.lane.b32.xlu2 %v2447_v45, %s2354_s20 }
 0x463   :  { %v2226_v3 = vpop.eup %2225 }
 0x464   :  { %v536_v4 = vsel %vm276_vm11, %v2226_v3, 0.0 }
 0x465   :  { %537 = vadd.xlane.f32.xlu0 %v536_v4 }
 0x470   :  { %v601_v5 = vpop.permute.xlu1 %600 }
 0x471   :  { %v606_v6 = vsel %vm583_vm13, %v601_v5, 0 }
 0x472   :  { %615 = vmatpush.bf16.msrb.mxu1 %v606_v6 }
 0x488   :  { %v499_v7 = vpop.xlane.xlu2 %498 }
 0x489   :  { %v511_v8 = vsub.f32 %v479_v28, %v499_v7 }
 0x48b   :  { %v524_v9 = vmul.f32 1.442695, %v511_v8 }
 0x48d   :  { %2227 = vpow2.f32 %v524_v9 }
 0x493   :  { %v2228_v10 = vpop.eup %2227 }
 0x494   :  { %v545_v11 = vsel %vm276_vm11, %v2228_v10, 0.0 }
 0x495   :  { %546 = vadd.xlane.f32.xlu0 %v545_v11 }
 0x496   :  { %v493_v14 = vpop.xlane.xlu0 %492 }
 0x497   :  { %v509_v45 = vsub.f32 %v477_v39, %v493_v14 }
 0x499   :  { %v520_v22 = vmul.f32 1.442695, %v509_v45 }
 0x49b   :  { %v496_v16 = vpop.xlane.xlu1 %495 }
 0x49c   :  { %v510_v17 = vsub.f32 %v478_v41, %v496_v16 }
 0x49e   :  { %v522_v18 = vmul.f32 1.442695, %v510_v17 }
 0x4a0   :  { %2229 = vpow2.f32 %v522_v18  ;;  %v505_v20 = vpop.xlane.xlu0 %504 }
 0x4a1   :  { %v513_v21 = vsub.f32 %v481_v50, %v505_v20 }
 0x4a3   :  { %v528_v24 = vmul.f32 1.442695, %v513_v21 }
 0x4a5   :  { %2231 = vpow2.f32 %v528_v24 }
 0x4a6   :  { %v2516_v25 = vpop.eup %2229  ;;  %2233 = vpow2.f32 %v520_v22 }
 0x4a7   :  { %v542_v26 = vsel %vm276_vm11, %v2516_v25, 0.0 }
 0x4a8   :  { %v535_v27 = vpop.xlane.xlu0 %534  ;;  %543 = vadd.xlane.f32.xlu1 %v542_v26 }
 0x4a9   :  { %2235 = vrcp.f32 %v535_v27 }
 0x4ab   :  { %v2232_v28 = vpop.eup %2231 }
 0x4ac   :  { %v2234_v29 = vpop.eup %2233  ;;  %v551_v30 = vsel %vm276_vm11, %v2232_v28, 0.0 }
 0x4ad   :  { %552 = vadd.xlane.f32.xlu2 %v551_v30  ;;  %v539_v34 = vsel %vm276_vm11, %v2234_v29, 0.0 }
 0x4af   :  { %v2236_v33 = vpop.eup %2235 }
 0x4b0   :  { %v563_v35 = vmul.f32 %v2236_v33, %v2222_v54  ;;  %540 = vadd.xlane.f32.xlu1 %v539_v34 }
 0x4b2   :  { %v571_v36 = vpack.c.bf16 %v563_v35, %v563_v35 }
 0x4b4   :  { %1963 = vmatmul.msk.bf16.vlgmr.msrb.gmra.mxu1 %vm276_vm11, %v571_v36 }
 0x4b5   :  { %v532_v37 = vpop.xlane.xlu2 %531 }
 0x4b6   :  { %2237 = vrcp.f32 %v532_v37  ;;  %v2115_v37 = vld [vmem:[#allocation2 + $0x60] sm:$0xff] }
 0x4bc   :  { %v2238_v38 = vpop.eup %2237 }
 0x4bd   :  { %v562_v39 = vmul.f32 %v2238_v38, %v2224_v61  ;;  %v502_v15 = vpop.xlane.xlu2 %501  ;;  %v2114_v38 = vld [vmem:[#allocation2 + $0x58] sm:$0xff] }
 0x4be   :  { %v512_v40 = vsub.f32 %v480_v0, %v502_v15 }
 0x4bf   :  { %v570_v41 = vpack.c.bf16 %v562_v39, %v562_v39 }
 0x4c0   :  { %v526_v42 = vmul.f32 1.442695, %v512_v40 }
 0x4c1   :  { %1962 = vmatmul.msk.bf16.vlgmr.msrb.gmra.mxu0 %vm276_vm11, %v570_v41 }
 0x4c2   :  { %2239 = vpow2.f32 %v526_v42 }
 0x4c5   :  { %684 = vrot.lane.b32.xlu2 %v2453_v49, %s2354_s20  ;;  %v706_v43 = vpop.permute.xlu2 %705 }
 0x4c6   :  { %v711_v46 = vsel %vm583_vm13, %v706_v43, 0 }
 0x4c7   :  { %720 = vmatpush.bf16.msra.mxu2 %v711_v46 }
 0x4c8   :  { %v2240_v47 = vpop.eup %2239 }
 0x4c9   :  { %726 = vrot.lane.b32.xlu1 %v2445_v44, %s2354_s20  ;;  %v548_v48 = vsel %vm276_vm11, %v2240_v47, 0.0 }
 0x4ca   :  { %549 = vadd.xlane.f32.xlu0 %v548_v48 }
 0x4d8   :  { %v538_v50 = vpop.xlane.xlu0 %537 }
 0x4d9   :  { %2241 = vrcp.f32 %v538_v50 }
 0x4de   :  { %663 = vrot.lane.b32.xlu0 %v2440_v32, %s2354_s20 }
 0x4df   :  { %v2242_v51 = vpop.eup %2241 }
 0x4e0   :  { %v564_v52 = vmul.f32 %v2242_v51, %v2226_v3 }
 0x4e2   :  { %v572_v53 = vpack.c.bf16 %v564_v52, %v564_v52 }
 0x4e4   :  { %1964 = vmatmul.msk.bf16.vlgmr.msrb.gmra.mxu2 %vm276_vm11, %v572_v53 }
 0x508   :  { %v547_v49 = vpop.xlane.xlu0 %546 }
 0x509   :  { %2243 = vrcp.f32 %v547_v49 }
 0x50f   :  { %v2244_v57 = vpop.eup %2243 }
 0x510   :  { %v567_v44 = vmul.f32 %v2244_v57, %v2228_v10 }
 0x512   :  { %v575_v62 = vpack.c.bf16 %v567_v44, %v567_v44 }
 0x51b   :  { %v544_v54 = vpop.xlane.xlu1 %543 }
 0x520   :  { %v553_v55 = vpop.xlane.xlu2 %552 }
 0x523   :  { %v541_v56 = vpop.xlane.xlu1 %540 }
 0x524   :  { %2245 = vrcp.f32 %v541_v56  ;;  %v2200_v56 = vld [vmem:[#allocation4 + $0x4] ss:$0 sm:$0xff] }
 0x525   :  { %2247 = vrcp.f32 %v553_v55 }
 0x528   :  { %v685_v58 = vpop.permute.xlu2 %684 }
 0x529   :  { %v690_v59 = vsel %vm583_vm13, %v685_v58, 0 }
 0x52a   :  { %v2246_v61 = vpop.eup %2245  ;;  %699 = vmatpush.bf16.msra.mxu1 %v690_v59 }
 0x52b   :  { %v565_v32 = vmul.f32 %v2246_v61, %v2234_v29  ;;  %v2248_v12 = vpop.eup %2247 }
 0x52c   :  { %v569_v1 = vmul.f32 %v2248_v12, %v2232_v28 }
 0x52d   :  { %v573_v63 = vpack.c.bf16 %v565_v32, %v565_v32  ;;  %1967 = vmatmul.msk.bf16.vlgmr.msra.gmra.mxu1 %vm276_vm11, %v575_v62 }
 0x52e   :  { %v577_v5 = vpack.c.bf16 %v569_v1, %v569_v1 }
 0x52f   :  { %1965 = vmatmul.msk.bf16.vlgmr.msrb.gmra.mxu3 %vm276_vm11, %v573_v63 }
 0x531   :  { %v617_v0 = vpop.f32.mrf.mxu1 }
 0x539   :  { %v619_v13 = vpop.f32.mrf.mxu1 }
 0x53b   :  { %v727_v2 = vpop.permute.xlu1 %726 }
 0x53c   :  { %v732_v3 = vsel %vm583_vm13, %v727_v2, 0 }
 0x53d   :  { %741 = vmatpush.bf16.msra.mxu3 %v732_v3  ;;  %v550_v4 = vpop.xlane.xlu0 %549 }
 0x53e   :  { %2249 = vrcp.f32 %v550_v4  ;;  %v596_v6 = vpop.f32.mrf.mxu0 }
 0x53f   :  { %2251 = vrcp.f32 %v544_v54 }
 0x540   :  { %1969 = vmatmul.msk.bf16.vlgmr.msra.gmra.mxu3 %vm276_vm11, %v577_v5 }
 0x544   :  { %v2250_v7 = vpop.eup %2249 }
 0x545   :  { %v568_v8 = vmul.f32 %v2250_v7, %v2240_v47  ;;  %v2252_v11 = vpop.eup %2251 }
 0x546   :  { %v598_v9 = vpop.f32.mrf.mxu0  ;;  %v566_v14 = vmul.f32 %v2252_v11, %v2516_v25  ;;  %v2125_v11 = vld [vmem:[#allocation2 + $0xb0] sm:$0xff] }
 0x547   :  { %v576_v10 = vpack.c.bf16 %v568_v8, %v568_v8  ;;  %v2116_v9 = vld [vmem:[#allocation2 + $0x68] sm:$0xff]  ;;  %974 = vmatpush.bf16.msrb.mxu2 %v2125_v11  ;;  %v2126_v11 = vld [vmem:[#allocation2 + $0xb8] sm:$0xff] }
 0x548   :  { %v574_v45 = vpack.c.bf16 %v566_v14, %v566_v14 }
 0x549   :  { %1968 = vmatmul.msk.bf16.vlgmr.msra.gmra.mxu2 %vm276_vm11, %v576_v10 }
 0x550   :  { %v664_v16 = vpop.permute.xlu0 %663 }
 0x551   :  { %v669_v17 = vsel %vm583_vm13, %v664_v16, 0 }
 0x552   :  { %678 = vmatpush.bf16.msra.mxu0 %v669_v17  ;;  %v2124_v17 = vld [vmem:[#allocation2 + $0xa8] sm:$0xff] }
 0x553   :  { %975 = vmatpush.bf16.msrb.mxu2 %v2124_v17 }
 0x555   :  { %1966 = vmatmul.msk.bf16.vlgmr.msra.gmra.mxu0 %vm276_vm11, %v574_v45 }
 0x556   :  { %807 = vmatpush.bf16.msrb.mxu0 %v2115_v37 }
 0x55a   :  { %808 = vmatpush.bf16.msrb.mxu0 %v2114_v38 }
 0x567   :  { %v638_v18 = vpop.f32.mrf.mxu2 }
 0x56f   :  { %v640_v20 = vpop.f32.mrf.mxu2 }
 0x5aa   :  { %v701_v21 = vpop.f32.mrf.mxu1 }
 0x5b2   :  { %v659_v22 = vpop.f32.mrf.mxu3  ;;  %v703_v24 = vpop.f32.mrf.mxu1 }
 0x5b3   :  { %v2168_v26 = vpack.i.bf16 %v659_v22, %v638_v18 }
 0x5b5   :  { %2169 = vrot.lane.b32.xlu0 %v2168_v26, %s2358_s1  ;;  %v2122_v26 = vld [vmem:[#allocation2 + $0x98] sm:$0xff] }
 0x5ba   :  { %v661_v27 = vpop.f32.mrf.mxu3 }
 0x5c3   :  { %v743_v28 = vpop.f32.mrf.mxu3 }
 0x5cb   :  { %v745_v29 = vpop.f32.mrf.mxu3 }
 0x5cc   :  { %v722_v30 = vpop.f32.mrf.mxu2 }
 0x5cd   :  { %v2178_v25 = vpack.i.bf16 %v743_v28, %v722_v30 }
 0x5cf   :  { %2179 = vrot.lane.b32.xlu2 %v2178_v25, %s2366_s4 }
 0x5d2   :  { %v680_v33 = vpop.f32.mrf.mxu0 }
 0x5d3   :  { %v2173_v34 = vpack.i.bf16 %v701_v21, %v680_v33  ;;  %v2123_v21 = vld [vmem:[#allocation2 + $0xa0] sm:$0xff] }
 0x5d4   :  { %v724_v35 = vpop.f32.mrf.mxu2  ;;  %976 = vmatpush.bf16.msrb.mxu2 %v2123_v21 }
 0x5d5   :  { %2174 = vrot.lane.b32.xlu1 %v2173_v34, %s2367_s5 }
 0x5d8   :  { %977 = vmatpush.bf16.msrb.mxu2 %v2122_v26 }
 0x5da   :  { %v682_v36 = vpop.f32.mrf.mxu0 }
 0x5db   :  { %v2201_v36 = vld [vmem:[#allocation4 + $0x2] ss:$0 sm:$0xff] }
 0x627   :  { %v2170_v39 = vpop.permute.xlu0 %2169 }
 0x628   :  { %v2172_v15 = vunpack.i.h.bf16 %v2170_v39  ;;  %v2171_v40 = vunpack.i.l.bf16 %v2170_v39 }
 0x629   :  { %v2180_v41 = vpop.permute.xlu2 %2179 }
 0x62a   :  { %v772_v47 = vsel %vm276_vm11, %v617_v0, %v2172_v15  ;;  %v771_v48 = vsel %vm276_vm11, %v596_v6, %v2171_v40  ;;  %v2182_v50 = vunpack.i.h.bf16 %v2180_v41  ;;  %v2181_v51 = vunpack.i.l.bf16 %v2180_v41  ;;  %v2202_v15 = vld [vmem:[#allocation4 + $0x3] ss:$0 sm:$0xff] }
 0x647   :  { %v2175_v42 = vpop.permute.xlu1 %2174 }
 0x648   :  { %v2177_v43 = vunpack.i.h.bf16 %v2175_v42  ;;  %v2176_v46 = vunpack.i.l.bf16 %v2175_v42 }
 0x64a   :  { %v775_v52 = vsel %vm773_vm14, %v772_v47, %v2177_v43  ;;  %v774_v53 = vsel %vm773_vm14, %v771_v48, %v2176_v46  ;;  %v2121_v48 = vld [vmem:[#allocation2 + $0x90] sm:$0xff] }
 0x64b   :  { %v777_v49 = vsel %vm776_vm15, %v774_v53, %v2181_v51  ;;  %v778_v54 = vsel %vm776_vm15, %v775_v52, %v2182_v50  ;;  %978 = vmatpush.bf16.msrb.mxu2 %v2121_v48  ;;  %v2120_v50 = vld [vmem:[#allocation2 + $0x88] sm:$0xff]  ;;  %v2119_v51 = vld [vmem:[#allocation2 + $0x80] sm:$0xff]  ;;  %v2118_v52 = vld [vmem:[#allocation2 + $0x78] sm:$0xff] }
 0x64c   :  { %v784_v55 = vpack.c.bf16 %v778_v54, %v777_v49  ;;  %v2203_v49 = vld [vmem:[#allocation4 + $0x5] ss:$0 sm:$0xff] }
 0x64e   :  { %1978 = vmatmul.msk.bf16.vlgmr.msrb.gmra.mxu0 %vm151_vm3, %v784_v55 }
 0x64f   :  { %979 = vmatpush.bf16.msrb.mxu2 %v2120_v50 }
 0x653   :  { %980 = vmatpush.bf16.msrb.mxu2 %v2119_v51 }
 0x657   :  { %981 = vmatpush.bf16.msrb.mxu2 %v2118_v52 }
 0x6cb   :  { %v810_v57 = vpop.f32.mrf.mxu0 }
 0x6cc   :  { %v811_v44 = vadd.f32 %v2200_v56, %v810_v57 }
 0x6ce   :  { %v815_v58 = vadd.f32 %v811_v44, %v2408_v19 }
 0x6d0   :  { %v819_v59 = vsel %vm151_vm3, %v815_v58, 0.0 }
 0x6d1   :  { %820 = vadd.xlane.f32.xlu0 %v819_v59  ;;  %v2204_v59 = vld [vmem:[#allocation4 + $0x6] ss:$0 sm:$0xff] }
 0x6d3   :  { %v812_v61 = vpop.f32.mrf.mxu0 }
 0x6d4   :  { %v813_v62 = vadd.f32 %v2200_v56, %v812_v61 }
 0x6d6   :  { %v816_v32 = vadd.f32 %v813_v62, %v2412_v23  ;;  %v2117_v23 = vld [vmem:[#allocation2 + $0x70] sm:$0xff] }
 0x6d7   :  { %914 = vmatpush.bf16.msrb.mxu1 %v2117_v23 }
 0x6d8   :  { %v822_v63 = vsel %vm151_vm3, %v816_v32, 0.0 }
 0x6d9   :  { %823 = vadd.xlane.f32.xlu1 %v822_v63 }
 0x6db   :  { %915 = vmatpush.bf16.msrb.mxu1 %v2116_v9 }
 0x744   :  { %v821_v0 = vpop.xlane.xlu0 %820 }
 0x745   :  { %v825_v12 = vmul.f32 %v821_v0, %v2416_v31 }
 0x747   :  { %v827_v13 = vsub.f32 %v815_v58, %v825_v12 }
 0x749   :  { %v829_v1 = vmul.f32 %v827_v13, %v827_v13 }
 0x74b   :  { %v831_v2 = vsel %vm151_vm3, %v829_v1, 0.0 }
 0x74c   :  { %v824_v3 = vpop.xlane.xlu1 %823  ;;  %832 = vadd.xlane.f32.xlu2 %v831_v2 }
 0x74d   :  { %v826_v19 = vmul.f32 %v824_v3, %v2416_v31 }
 0x74f   :  { %v828_v4 = vsub.f32 %v816_v32, %v826_v19 }
 0x751   :  { %v830_v5 = vmul.f32 %v828_v4, %v828_v4 }
 0x753   :  { %v834_v6 = vsel %vm151_vm3, %v830_v5, 0.0 }
 0x754   :  { %835 = vadd.xlane.f32.xlu0 %v834_v6 }
 0x7bf   :  { %v833_v7 = vpop.xlane.xlu2 %832 }
 0x7c0   :  { %v837_v8 = vmul.f32 %v833_v7, %v2416_v31 }
 0x7c2   :  { %v839_v10 = vadd.f32 1e-05, %v837_v8  ;;  %v2127_v8 = vld [vmem:[#allocation2 + $0xc0] sm:$0xff] }
 0x7c3   :  { %1066 = vmatpush.bf16.msrb.mxu3 %v2127_v8 }
 0x7c4   :  { %2253 = vrsqrt.f32 %v839_v10  ;;  %vm847_vm1 = vweird.f32 %v839_v10 }
 0x7c7   :  { %v836_v14 = vpop.xlane.xlu0 %835  ;;  %1067 = vmatpush.bf16.msrb.mxu3 %v2126_v11 }
 0x7c8   :  { %v838_v16 = vmul.f32 %v836_v14, %v2416_v31 }
 0x7ca   :  { %v2254_v45 = vpop.eup %2253  ;;  %v840_v18 = vadd.f32 1e-05, %v838_v16 }
 0x7cb   :  { %v842_v20 = vmul.f32 %v2254_v45, %v839_v10  ;;  %vm848_vm0 = vweird.f32 %v2254_v45 }
 0x7cc   :  { %2255 = vrsqrt.f32 %v840_v18  ;;  %vm849_vm2 = vmor %vm847_vm1, %vm848_vm0  ;;  %vm857_vm5 = vweird.f32 %v840_v18 }
 0x7cd   :  { %v843_v22 = vmul.f32 %v2254_v45, %v842_v20 }
 0x7cf   :  { %v844_v24 = vmul.f32 0.5, %v843_v22 }
 0x7d1   :  { %v845_v27 = vsub.f32 1.5, %v844_v24 }
 0x7d2   :  { %v2256_v28 = vpop.eup %2255 }
 0x7d3   :  { %v846_v29 = vmul.f32 %v2254_v45, %v845_v27  ;;  %v852_v30 = vmul.f32 %v2256_v28, %v840_v18  ;;  %vm858_vm4 = vweird.f32 %v2256_v28 }
 0x7d4   :  { %vm859_vm6 = vmor %vm857_vm5, %vm858_vm4 }
 0x7d5   :  { %v853_v25 = vmul.f32 %v2256_v28, %v852_v30  ;;  %v850_v33 = vsel %vm849_vm2, %v2254_v45, %v846_v29 }
 0x7d6   :  { %v861_v37 = vmul.f32 %v850_v33, %v827_v13 }
 0x7d7   :  { %v854_v34 = vmul.f32 0.5, %v853_v25 }
 0x7d8   :  { %v864_v40 = vmul.f32 %v2201_v36, %v861_v37 }
 0x7d9   :  { %v855_v35 = vsub.f32 1.5, %v854_v34  ;;  %v2205_v34 = vld [vmem:[#allocation4 + $0x7] ss:$0 sm:$0xff] }
 0x7da   :  { %v867_v43 = vadd.f32 %v2202_v15, %v864_v40 }
 0x7db   :  { %v856_v38 = vmul.f32 %v2256_v28, %v855_v35 }
 0x7dd   :  { %v860_v39 = vsel %vm859_vm6, %v2256_v28, %v856_v38  ;;  %v2206_v38 = vld [vmem:[#allocation4 + $0x8] ss:$0 sm:$0xff] }
 0x7de   :  { %v862_v41 = vmul.f32 %v860_v39, %v828_v4 }
 0x7e0   :  { %v865_v42 = vmul.f32 %v2201_v36, %v862_v41 }
 0x7e2   :  { %v868_v46 = vadd.f32 %v2202_v15, %v865_v42 }
 0x7e4   :  { %v891_v47 = vpack.c.bf16 %v868_v46, %v867_v43 }
 0x7e6   :  { %1987 = vmatmul.msk.bf16.vlgmr.msrb.gmra.mxu1 %vm151_vm3, %v891_v47 }
 0x863   :  { %v917_v53 = vpop.f32.mrf.mxu1 }
 0x864   :  { %v918_v54 = vadd.f32 %v2203_v49, %v917_v53 }
 0x866   :  { %v922_v57 = vmax.f32 %v918_v54, 0.0 }
 0x86b   :  { %v919_v55 = vpop.f32.mrf.mxu1 }
 0x86c   :  { %v920_v56 = vadd.f32 %v2203_v49, %v919_v55 }
 0x86e   :  { %v923_v44 = vmax.f32 %v920_v56, 0.0 }
 0x870   :  { %v924_v58 = vpack.c.bf16 %v923_v44, %v922_v57 }
 0x872   :  { %982 = vmatmul.bf16.vlgmr.msrb.gmra.mxu2 %v924_v58 }
 0x8f5   :  { %v983_v61 = vpop.f32.mrf.mxu2 }
 0x8f6   :  { %v2563_v62 = vadd.f32 %v2204_v59, %v983_v61 }
 0x8f8   :  { %v990_v32 = vsel %vm151_vm3, %v2563_v62, 0.0 }
 0x8f9   :  { %991 = vadd.xlane.f32.xlu1 %v990_v32 }
 0x8fd   :  { %v985_v63 = vpop.f32.mrf.mxu2 }
 0x8fe   :  { %v2567_v0 = vadd.f32 %v2204_v59, %v985_v63 }
 0x900   :  { %v993_v12 = vsel %vm151_vm3, %v2567_v0, 0.0 }
 0x901   :  { %994 = vadd.xlane.f32.xlu2 %v993_v12 }
 0x96c   :  { %v992_v13 = vpop.xlane.xlu1 %991 }
 0x96d   :  { %v996_v1 = vmul.f32 %v992_v13, %v2416_v31 }
 0x96f   :  { %v998_v2 = vsub.f32 %v2563_v62, %v996_v1 }
 0x971   :  { %v1000_v3 = vmul.f32 %v998_v2, %v998_v2 }
 0x973   :  { %v1002_v19 = vsel %vm151_vm3, %v1000_v3, 0.0 }
 0x974   :  { %v995_v4 = vpop.xlane.xlu2 %994  ;;  %1003 = vadd.xlane.f32.xlu0 %v1002_v19 }
 0x975   :  { %v997_v5 = vmul.f32 %v995_v4, %v2416_v31 }
 0x977   :  { %v999_v6 = vsub.f32 %v2567_v0, %v997_v5 }
 0x979   :  { %v1001_v23 = vmul.f32 %v999_v6, %v999_v6 }
 0x97b   :  { %v1005_v7 = vsel %vm151_vm3, %v1001_v23, 0.0 }
 0x97c   :  { %1006 = vadd.xlane.f32.xlu1 %v1005_v7 }
 0x9e7   :  { %v1004_v9 = vpop.xlane.xlu0 %1003 }
 0x9e8   :  { %v1008_v10 = vmul.f32 %v1004_v9, %v2416_v31 }
 0x9ea   :  { %v1010_v14 = vadd.f32 1e-05, %v1008_v10 }
 0x9ec   :  { %2257 = vrsqrt.f32 %v1010_v14  ;;  %vm1018_vm8 = vweird.f32 %v1010_v14 }
 0x9ef   :  { %v1007_v16 = vpop.xlane.xlu1 %1006 }
 0x9f0   :  { %v1009_v17 = vmul.f32 %v1007_v16, %v2416_v31 }
 0x9f2   :  { %v2258_v45 = vpop.eup %2257  ;;  %v1011_v18 = vadd.f32 1e-05, %v1009_v17 }
 0x9f3   :  { %v1013_v20 = vmul.f32 %v2258_v45, %v1010_v14  ;;  %vm1019_vm7 = vweird.f32 %v2258_v45 }
 0x9f4   :  { %2259 = vrsqrt.f32 %v1011_v18  ;;  %vm1020_vm9 = vmor %vm1018_vm8, %vm1019_vm7  ;;  %vm1028_vm0 = vweird.f32 %v1011_v18 }
 0x9f5   :  { %v1014_v21 = vmul.f32 %v2258_v45, %v1013_v20 }
 0x9f7   :  { %v1015_v22 = vmul.f32 0.5, %v1014_v21 }
 0x9f9   :  { %v1016_v24 = vsub.f32 1.5, %v1015_v22 }
 0x9fa   :  { %v2260_v26 = vpop.eup %2259 }
 0x9fb   :  { %v1017_v27 = vmul.f32 %v2258_v45, %v1016_v24  ;;  %v1023_v28 = vmul.f32 %v2260_v26, %v1011_v18  ;;  %vm1029_vm10 = vweird.f32 %v2260_v26 }
 0x9fc   :  { %vm1030_vm1 = vmor %vm1028_vm0, %vm1029_vm10 }
 0x9fd   :  { %v1024_v29 = vmul.f32 %v2260_v26, %v1023_v28  ;;  %v1021_v30 = vsel %vm1020_vm9, %v2258_v45, %v1017_v27 }
 0x9fe   :  { %v1032_v35 = vmul.f32 %v1021_v30, %v998_v2 }
 0x9ff   :  { %v1025_v25 = vmul.f32 0.5, %v1024_v29 }
 0xa00   :  { %v1035_v39 = vmul.f32 %v2205_v34, %v1032_v35 }
 0xa01   :  { %v1026_v33 = vsub.f32 1.5, %v1025_v25 }
 0xa02   :  { %v1038_v41 = vadd.f32 %v2206_v38, %v1035_v39 }
 0xa03   :  { %v1027_v36 = vmul.f32 %v2260_v26, %v1026_v33 }
 0xa05   :  { %v1031_v37 = vsel %vm1030_vm1, %v2260_v26, %v1027_v36 }
 0xa06   :  { %v1033_v15 = vmul.f32 %v1031_v37, %v999_v6 }
 0xa08   :  { %v1036_v40 = vmul.f32 %v2205_v34, %v1033_v15 }
 0xa0a   :  { %v1039_v42 = vadd.f32 %v2206_v38, %v1036_v40 }
 0xa0c   :  { %v1044_v43 = vpack.c.bf16 %v1039_v42, %v1038_v41 }
 0xa0e   :  { %2028 = vmatmul.msk.bf16.vlgmr.msrb.gmra.mxu3 %vm151_vm3, %v1044_v43 }
 0xa91   :  { %v1069_v46 = vpop.f32.mrf.mxu3 }
 0xa92   :  { %1076 = vrot.lane.b32.xlu2 %v1069_v46, %s2362_s0  ;;  %v1094_v47 = vpack.c.bf16 %v1069_v46, %v1069_v46 }
 0xa94   :  { %v1103_v50 = vunpack.c.l.b16 %v1094_v47 }
 0xa96   :  { %v2584_v51 = vpack.c.b16 %v1103_v50, %v1103_v50 }
 0xa99   :  { %v1071_v48 = vpop.f32.mrf.mxu3 }
 0xa9a   :  { %1082 = vrot.lane.b32.xlu2 %v1069_v46, %s2363_s28  ;;  %1084 = vrot.lane.b32.xlu1 %v1071_v48, %s2363_s28  ;;  %v1095_v52 = vpack.c.bf16 %v1071_v48, %v1071_v48 }
 0xa9b   :  { %1078 = vrot.lane.b32.xlu0 %v1071_v48, %s2362_s0 }
 0xa9c   :  { %v1127_v53 = vunpack.c.l.b16 %v1095_v52 }
 0xa9e   :  { %v1128_v49 = vpack.c.b16 %v1127_v53, %v1127_v53 }
 0xaa2   :  { %1105 = vrot.lane.b32.xlu1 %v2584_v51, %s2364_s29 }
 0xaa3   :  { %1088 = vrot.lane.b32.xlu0 %v1069_v46, %s2365_s30 }
 0xaab   :  { %1090 = vrot.lane.b32.xlu0 %v1071_v48, %s2365_s30 }
 0xab3   :  { %1129 = vrot.lane.b32.xlu0 %v1128_v49, %s2364_s29 }
 0xaec   :  { %v1077_v54 = vpop.permute.xlu2 %1076 }
 0xaed   :  { %v1096_v55 = vpack.c.bf16 %v1077_v54, %v1077_v54 }
 0xaef   :  { %v1151_v56 = vunpack.c.l.b16 %v1096_v55 }
 0xaf1   :  { %v2591_v57 = vpack.c.b16 %v1151_v56, %v1151_v56 }
 0xaf3   :  { %1153 = vrot.lane.b32.xlu2 %v2591_v57, %s2364_s29 }
 0xaf4   :  { %v1083_v32 = vpop.permute.xlu2 %1082 }
 0xaf5   :  { %v1098_v1 = vpack.c.bf16 %v1083_v32, %v1083_v32 }
 0xaf7   :  { %v1199_v5 = vunpack.c.l.b16 %v1098_v1 }
 0xaf9   :  { %v2604_v7 = vpack.c.b16 %v1199_v5, %v1199_v5 }
 0xb0c   :  { %v1085_v44 = vpop.permute.xlu1 %1084 }
 0xb0d   :  { %v1099_v58 = vpack.c.bf16 %v1085_v44, %v1085_v44  ;;  %v1079_v59 = vpop.permute.xlu0 %1078 }
 0xb0e   :  { %v1097_v61 = vpack.c.bf16 %v1079_v59, %v1079_v59 }
 0xb0f   :  { %v1223_v63 = vunpack.c.l.b16 %v1099_v58 }
 0xb10   :  { %v1175_v12 = vunpack.c.l.b16 %v1097_v61 }
 0xb11   :  { %v2595_v13 = vpack.c.b16 %v1223_v63, %v1223_v63 }
 0xb12   :  { %v2597_v2 = vpack.c.b16 %v1175_v12, %v1175_v12 }
 0xb13   :  { %1225 = vrot.lane.b32.xlu2 %v2595_v13, %s2364_s29 }
 0xb14   :  { %1177 = vrot.lane.b32.xlu1 %v2597_v2, %s2364_s29  ;;  %v1106_v3 = vpop.permute.xlu1 %1105 }
 0xb15   :  { %v1111_v19 = vsel %vm276_vm11, %v1106_v3, 0  ;;  %v1089_v4 = vpop.permute.xlu0 %1088 }
 0xb16   :  { %v1100_v6 = vpack.c.bf16 %v1089_v4, %v1089_v4  ;;  %1120 = vmatpush.bf16.xpose.msra.mxu0 %v1111_v19 }
 0xb18   :  { %v1247_v23 = vunpack.c.l.b16 %v1100_v6 }
 0xb1a   :  { %v2606_v8 = vpack.c.b16 %v1247_v23, %v1247_v23 }
 0xb1c   :  { %1201 = vrot.lane.b32.xlu1 %v2604_v7, %s2364_s29  ;;  %1249 = vrot.lane.b32.xlu0 %v2606_v8, %s2364_s29 }
 0xb1d   :  { %v1091_v9 = vpop.permute.xlu0 %1090  ;;  %2029 = vmatmul.msk.bf16.vlgmr.msra.gmra.mxu0 %vm276_vm11, %v1094_v47 }
 0xb1e   :  { %v1101_v10 = vpack.c.bf16 %v1091_v9, %v1091_v9 }
 0xb20   :  { %v1271_v11 = vunpack.c.l.b16 %v1101_v10 }
 0xb22   :  { %v2613_v14 = vpack.c.b16 %v1271_v11, %v1271_v11 }
 0xb24   :  { %1273 = vrot.lane.b32.xlu2 %v2613_v14, %s2364_s29  ;;  %1427 = vrot.lane.b32.xlu0 %v1128_v49, %s2354_s20 }
 0xb25   :  { %v1130_v16 = vpop.permute.xlu0 %1129 }
 0xb26   :  { %v1135_v17 = vsel %vm276_vm11, %v1130_v16, 0 }
 0xb27   :  { %1144 = vmatpush.bf16.xpose.msra.mxu1 %v1135_v17 }
 0xb2e   :  { %2030 = vmatmul.msk.bf16.vlgmr.msra.gmra.mxu1 %vm276_vm11, %v1095_v52 }
 0xb4d   :  { %v1154_v45 = vpop.permute.xlu2 %1153 }
 0xb4e   :  { %v1159_v18 = vsel %vm276_vm11, %v1154_v45, 0 }
 0xb4f   :  { %1168 = vmatpush.bf16.xpose.msra.mxu3 %v1159_v18 }
 0xb56   :  { %2031 = vmatmul.msk.bf16.vlgmr.msra.gmra.mxu3 %vm276_vm11, %v1096_v55 }
 0xb6d   :  { %v1226_v20 = vpop.permute.xlu2 %1225 }
 0xb6e   :  { %v1231_v21 = vsel %vm276_vm11, %v1226_v20, 0 }
 0xb6f   :  { %1240 = vmatpush.bf16.xpose.msra.mxu2 %v1231_v21 }
 0xb76   :  { %2034 = vmatmul.msk.bf16.vlgmr.msra.gmra.mxu2 %vm276_vm11, %v1099_v58 }
 0xb7e   :  { %v1274_v22 = vpop.permute.xlu2 %1273 }
 0xb7f   :  { %v1279_v27 = vsel %vm276_vm11, %v1274_v22, 0 }
 0xb86   :  { %v1178_v24 = vpop.permute.xlu1 %1177 }
 0xb87   :  { %v1183_v26 = vsel %vm276_vm11, %v1178_v24, 0 }
 0xb88   :  { %1192 = vmatpush.bf16.xpose.msrb.mxu0 %v1183_v26 }
 0xb8e   :  { %v1202_v28 = vpop.permute.xlu1 %1201  ;;  %v1250_v29 = vpop.permute.xlu0 %1249 }
 0xb8f   :  { %v1207_v30 = vsel %vm276_vm11, %v1202_v28, 0  ;;  %v1255_v25 = vsel %vm276_vm11, %v1250_v29, 0  ;;  %2032 = vmatmul.msk.bf16.vlgmr.msrb.gmra.mxu0 %vm276_vm11, %v1097_v61 }
 0xb90   :  { %1288 = vmatpush.bf16.xpose.msra.mxu0 %v1279_v27  ;;  %1216 = vmatpush.bf16.xpose.msrb.mxu1 %v1207_v30 }
 0xb91   :  { %1264 = vmatpush.bf16.xpose.msrb.mxu3 %v1255_v25 }
 0xb96   :  { %v1428_v33 = vpop.permute.xlu0 %1427 }
 0xb97   :  { %v1433_v34 = vsel %vm583_vm13, %v1428_v33, 0  ;;  %2033 = vmatmul.msk.bf16.vlgmr.msrb.gmra.mxu1 %vm276_vm11, %v1098_v1 }
 0xb98   :  { %2035 = vmatmul.msk.bf16.vlgmr.msrb.gmra.mxu3 %vm276_vm11, %v1100_v6  ;;  %1442 = vmatpush.bf16.msrb.mxu2 %v1433_v34 }
 0xb9a   :  { %v1122_v35 = vpop.f32.mrf.mxu0 }
 0xb9b   :  { %v1294_v36 = vmul.f32 0.35355338, %v1122_v35 }
 0xb9d   :  { %v1302_v37 = vsel %vm2468_vm12, %v1294_v36, -1e+30 }
 0xb9e   :  { %v1310_v38 = vsel %vm276_vm11, %v1302_v37, -inf }
 0xb9f   :  { %2036 = vmatmul.msk.bf16.vlgmr.msra.gmra.mxu0 %vm276_vm11, %v1101_v10  ;;  %1311 = vmax.xlane.f32.xlu2 %v1310_v38 }
 0xba2   :  { %v1124_v39 = vpop.f32.mrf.mxu0 }
 0xbab   :  { %v1146_v15 = vpop.f32.mrf.mxu1 }
 0xbac   :  { %v1295_v40 = vmul.f32 0.35355338, %v1146_v15 }
 0xbae   :  { %v1303_v41 = vsel %vm2468_vm12, %v1295_v40, -1e+30 }
 0xbaf   :  { %v1313_v42 = vsel %vm276_vm11, %v1303_v41, -inf }
 0xbb0   :  { %1314 = vmax.xlane.f32.xlu0 %v1313_v42 }
 0xbb3   :  { %v1148_v43 = vpop.f32.mrf.mxu1 }
 0xbd9   :  { %v1170_v46 = vpop.f32.mrf.mxu3 }
 0xbda   :  { %v1296_v47 = vmul.f32 0.35355338, %v1170_v46 }
 0xbdc   :  { %v1304_v48 = vsel %vm2468_vm12, %v1296_v47, -1e+30 }
 0xbdd   :  { %v1316_v50 = vsel %vm276_vm11, %v1304_v48, -inf }
 0xbde   :  { %1317 = vmax.xlane.f32.xlu1 %v1316_v50 }
 0xbe1   :  { %v1172_v52 = vpop.f32.mrf.mxu3 }
 0xbf9   :  { %v1242_v53 = vpop.f32.mrf.mxu2 }
 0xbfa   :  { %v1299_v23 = vmul.f32 0.35355338, %v1242_v53 }
 0xbfc   :  { %v1307_v16 = vsel %vm2468_vm12, %v1299_v23, -1e+30 }
 0xbfd   :  { %v1325_v20 = vsel %vm276_vm11, %v1307_v16, -inf }
 0xc01   :  { %v1244_v49 = vpop.f32.mrf.mxu2 }
 0xc0c   :  { %v1194_v54 = vpop.f32.mrf.mxu0 }
 0xc0d   :  { %v1297_v12 = vmul.f32 0.35355338, %v1194_v54 }
 0xc0f   :  { %v1305_v5 = vsel %vm2468_vm12, %v1297_v12, -1e+30 }
 0xc10   :  { %v1319_v9 = vsel %vm276_vm11, %v1305_v5, -inf }
 0xc12   :  { %v1312_v55 = vpop.xlane.xlu2 %1311 }
 0xc13   :  { %v1334_v56 = vsub.f32 %v1302_v37, %v1312_v55 }
 0xc14   :  { %v1196_v44 = vpop.f32.mrf.mxu0  ;;  %v1218_v58 = vpop.f32.mrf.mxu1 }
 0xc15   :  { %v1342_v59 = vmul.f32 1.442695, %v1334_v56  ;;  %v1298_v61 = vmul.f32 0.35355338, %v1218_v58 }
 0xc17   :  { %2261 = vpow2.f32 %v1342_v59  ;;  %v1306_v32 = vsel %vm2468_vm12, %v1298_v61, -1e+30 }
 0xc18   :  { %v1322_v63 = vsel %vm276_vm11, %v1306_v32, -inf }
 0xc19   :  { %1323 = vmax.xlane.f32.xlu0 %v1322_v63 }
 0xc1b   :  { %v1266_v1 = vpop.f32.mrf.mxu3 }
 0xc1c   :  { %v1220_v3 = vpop.f32.mrf.mxu1  ;;  %v1290_v19 = vpop.f32.mrf.mxu0  ;;  %v1300_v28 = vmul.f32 0.35355338, %v1266_v1 }
 0xc1d   :  { %v2645_v4 = vpop.eup %2261  ;;  %v1301_v21 = vmul.f32 0.35355338, %v1290_v19 }
 0xc1e   :  { %v1358_v6 = vsel %vm276_vm11, %v2645_v4, 0.0  ;;  %v1308_v29 = vsel %vm2468_vm12, %v1300_v28, -1e+30 }
 0xc1f   :  { %1359 = vadd.xlane.f32.xlu1 %v1358_v6  ;;  %v1309_v22 = vsel %vm2468_vm12, %v1301_v21, -1e+30  ;;  %v1328_v30 = vsel %vm276_vm11, %v1308_v29, -inf }
 0xc20   :  { %v1331_v26 = vsel %vm276_vm11, %v1309_v22, -inf }
 0xc21   :  { %1320 = vmax.xlane.f32.xlu0 %v1319_v9 }
 0xc23   :  { %v1268_v10 = vpop.f32.mrf.mxu3  ;;  %v1315_v11 = vpop.xlane.xlu0 %1314 }
 0xc24   :  { %v1335_v17 = vsub.f32 %v1303_v41, %v1315_v11  ;;  %v1292_v45 = vpop.f32.mrf.mxu0 }
 0xc26   :  { %v1344_v18 = vmul.f32 1.442695, %v1335_v17 }
 0xc27   :  { %1326 = vmax.xlane.f32.xlu1 %v1325_v20 }
 0xc28   :  { %2263 = vpow2.f32 %v1344_v18 }
 0xc2e   :  { %v2264_v24 = vpop.eup %2263 }
 0xc2f   :  { %1332 = vmax.xlane.f32.xlu1 %v1331_v26  ;;  %v1361_v27 = vsel %vm276_vm11, %v2264_v24, 0.0 }
 0xc30   :  { %1362 = vadd.xlane.f32.xlu2 %v1361_v27 }
 0xc35   :  { %1469 = vrot.lane.b32.xlu0 %v2597_v2, %s2354_s20 }
 0xc38   :  { %1329 = vmax.xlane.f32.xlu2 %v1328_v30 }
 0xc48   :  { %1448 = vrot.lane.b32.xlu1 %v2591_v57, %s2354_s20 }
 0xc50   :  { %1406 = vrot.lane.b32.xlu2 %v2584_v51, %s2354_s20 }
 0xc51   :  { %v1318_v25 = vpop.xlane.xlu1 %1317 }
 0xc52   :  { %v1336_v35 = vsub.f32 %v1304_v48, %v1318_v25 }
 0xc54   :  { %v1346_v37 = vmul.f32 1.442695, %v1336_v35 }
 0xc8c   :  { %v1324_v33 = vpop.xlane.xlu0 %1323 }
 0xc8d   :  { %v1338_v34 = vsub.f32 %v1306_v32, %v1324_v33 }
 0xc8f   :  { %v1350_v36 = vmul.f32 1.442695, %v1338_v34 }
 0xc91   :  { %2265 = vpow2.f32 %v1350_v36 }
 0xc92   :  { %v1360_v60 = vpop.xlane.xlu1 %1359  ;;  %2267 = vpow2.f32 %v1346_v37 }
 0xc94   :  { %v1321_v38 = vpop.xlane.xlu0 %1320 }
 0xc95   :  { %v1337_v39 = vsub.f32 %v1305_v5, %v1321_v38 }
 0xc97   :  { %v2668_v2 = vpop.eup %2265  ;;  %v1348_v15 = vmul.f32 1.442695, %v1337_v39 }
 0xc98   :  { %v1370_v57 = vsel %vm276_vm11, %v2668_v2, 0.0  ;;  %v2268_v41 = vpop.eup %2267 }
 0xc99   :  { %2269 = vpow2.f32 %v1348_v15  ;;  %1371 = vadd.xlane.f32.xlu0 %v1370_v57  ;;  %v1364_v46 = vsel %vm276_vm11, %v2268_v41, 0.0 }
 0xc9a   :  { %v1327_v51 = vpop.xlane.xlu1 %1326 }
 0xc9b   :  { %v1339_v40 = vsub.f32 %v1307_v16, %v1327_v51 }
 0xc9d   :  { %v1352_v42 = vmul.f32 1.442695, %v1339_v40 }
 0xc9f   :  { %v2270_v43 = vpop.eup %2269  ;;  %2271 = vpow2.f32 %v1352_v42 }
 0xca0   :  { %v1367_v47 = vsel %vm276_vm11, %v2270_v43, 0.0 }
 0xca1   :  { %1365 = vadd.xlane.f32.xlu0 %v1364_v46  ;;  %1368 = vadd.xlane.f32.xlu2 %v1367_v47 }
 0xca2   :  { %v1333_v48 = vpop.xlane.xlu1 %1332 }
 0xca3   :  { %v1341_v50 = vsub.f32 %v1309_v22, %v1333_v48  ;;  %v1363_v52 = vpop.xlane.xlu2 %1362 }
 0xca4   :  { %2273 = vrcp.f32 %v1363_v52 }
 0xca5   :  { %v2674_v53 = vpop.eup %2271  ;;  %v1356_v49 = vmul.f32 1.442695, %v1341_v50 }
 0xca6   :  { %v1373_v54 = vsel %vm276_vm11, %v2674_v53, 0.0 }
 0xca7   :  { %2275 = vpow2.f32 %v1356_v49  ;;  %v1470_v55 = vpop.permute.xlu0 %1469 }
 0xca8   :  { %v1475_v56 = vsel %vm583_vm13, %v1470_v55, 0  ;;  %2277 = vrcp.f32 %v1360_v60 }
 0xca9   :  { %1374 = vadd.xlane.f32.xlu2 %v1373_v54  ;;  %1484 = vmatpush.bf16.msrb.mxu0 %v1475_v56 }
 0xcaa   :  { %v2274_v44 = vpop.eup %2273 }
 0xcab   :  { %v1391_v58 = vmul.f32 %v2274_v44, %v2264_v24  ;;  %v1330_v59 = vpop.xlane.xlu2 %1329 }
 0xcac   :  { %v1340_v61 = vsub.f32 %v1308_v29, %v1330_v59 }
 0xcad   :  { %v2276_v32 = vpop.eup %2275  ;;  %v1399_v63 = vpack.c.bf16 %v1391_v58, %v1391_v58 }
 0xcae   :  { %v1354_v12 = vmul.f32 1.442695, %v1340_v61  ;;  %v1379_v1 = vsel %vm276_vm11, %v2276_v32, 0.0  ;;  %v2278_v3 = vpop.eup %2277 }
 0xcaf   :  { %2038 = vmatmul.msk.bf16.vlgmr.msrb.gmra.mxu2 %vm276_vm11, %v1399_v63  ;;  %v1390_v19 = vmul.f32 %v2278_v3, %v2645_v4  ;;  %v2128_v3 = vld [vmem:[#allocation2 + $0xc8] sm:$0xff] }
 0xcb0   :  { %2279 = vpow2.f32 %v1354_v12 }
 0xcb1   :  { %1380 = vadd.xlane.f32.xlu2 %v1379_v1  ;;  %v1398_v9 = vpack.c.bf16 %v1390_v19, %v1390_v19  ;;  %v2129_v1 = vld [vmem:[#allocation2 + $0xd0] sm:$0xff] }
 0xcb3   :  { %v1407_v5 = vpop.permute.xlu2 %1406 }
 0xcb4   :  { %v1412_v6 = vsel %vm583_vm13, %v1407_v5, 0 }
 0xcb5   :  { %1421 = vmatpush.bf16.msra.mxu1 %v1412_v6  ;;  %1532 = vrot.lane.b32.xlu0 %v2606_v8, %s2354_s20 }
 0xcb6   :  { %v2280_v23 = vpop.eup %2279 }
 0xcb7   :  { %v1376_v10 = vsel %vm276_vm11, %v2280_v23, 0.0 }
 0xcb8   :  { %1377 = vadd.xlane.f32.xlu1 %v1376_v10  ;;  %2037 = vmatmul.msk.bf16.vlgmr.msra.gmra.mxu1 %vm276_vm11, %v1398_v9 }
 0xcba   :  { %v1449_v11 = vpop.permute.xlu1 %1448 }
 0xcbb   :  { %v1454_v16 = vsel %vm583_vm13, %v1449_v11, 0 }
 0xcbc   :  { %1463 = vmatpush.bf16.msra.mxu3 %v1454_v16 }
 0xcbd   :  { %1553 = vrot.lane.b32.xlu0 %v2613_v14, %s2354_s20 }
 0xcc9   :  { %1490 = vrot.lane.b32.xlu2 %v2604_v7, %s2354_s20 }
 0xcd1   :  { %1511 = vrot.lane.b32.xlu1 %v2595_v13, %s2354_s20 }
 0xd0c   :  { %v1372_v8 = vpop.xlane.xlu0 %1371 }
 0xd14   :  { %v1369_v4 = vpop.xlane.xlu2 %1368  ;;  %v1366_v17 = vpop.xlane.xlu0 %1365 }
 0xd15   :  { %2281 = vrcp.f32 %v1369_v4 }
 0xd16   :  { %2283 = vrcp.f32 %v1366_v17 }
 0xd17   :  { %2285 = vrcp.f32 %v1372_v8 }
 0xd1b   :  { %v2282_v45 = vpop.eup %2281 }
 0xd1c   :  { %v2284_v18 = vpop.eup %2283  ;;  %v1393_v20 = vmul.f32 %v2282_v45, %v2270_v43  ;;  %v1375_v21 = vpop.xlane.xlu2 %1374 }
 0xd1d   :  { %v1392_v22 = vmul.f32 %v2284_v18, %v2268_v41  ;;  %v2286_v14 = vpop.eup %2285 }
 0xd1e   :  { %v1401_v24 = vpack.c.bf16 %v1393_v20, %v1393_v20  ;;  %v1394_v29 = vmul.f32 %v2286_v14, %v2668_v2 }
 0xd1f   :  { %v1400_v26 = vpack.c.bf16 %v1392_v22, %v1392_v22 }
 0xd20   :  { %2040 = vmatmul.msk.bf16.vlgmr.msrb.gmra.mxu0 %vm276_vm11, %v1401_v24  ;;  %v1402_v35 = vpack.c.bf16 %v1394_v29, %v1394_v29  ;;  %v2207_v24 = vld [vmem:[#allocation4 + $0xb] ss:$0 sm:$0xff] }
 0xd21   :  { %2039 = vmatmul.msk.bf16.vlgmr.msra.gmra.mxu3 %vm276_vm11, %v1400_v26 }
 0xd24   :  { %v1381_v7 = vpop.xlane.xlu2 %1380 }
 0xd25   :  { %2287 = vrcp.f32 %v1381_v7 }
 0xd27   :  { %v1533_v13 = vpop.permute.xlu0 %1532 }
 0xd28   :  { %v1538_v27 = vsel %vm583_vm13, %v1533_v13, 0 }
 0xd29   :  { %1547 = vmatpush.bf16.msrb.mxu3 %v1538_v27 }
 0xd2b   :  { %v2288_v28 = vpop.eup %2287  ;;  %v1378_v30 = vpop.xlane.xlu1 %1377 }
 0xd2c   :  { %2289 = vrcp.f32 %v1378_v30  ;;  %v1491_v25 = vpop.permute.xlu2 %1490  ;;  %v1397_v34 = vmul.f32 %v2288_v28, %v2276_v32 }
 0xd2d   :  { %v1496_v33 = vsel %vm583_vm13, %v1491_v25, 0  ;;  %2291 = vrcp.f32 %v1375_v21 }
 0xd2e   :  { %1505 = vmatpush.bf16.msrb.mxu1 %v1496_v33  ;;  %v1405_v38 = vpack.c.bf16 %v1397_v34, %v1397_v34 }
 0xd2f   :  { %v1554_v36 = vpop.permute.xlu0 %1553 }
 0xd30   :  { %v1559_v60 = vsel %vm583_vm13, %v1554_v36, 0 }
 0xd31   :  { %2041 = vmatmul.msk.bf16.vlgmr.msrb.gmra.mxu1 %vm276_vm11, %v1402_v35  ;;  %1568 = vmatpush.bf16.msra.mxu0 %v1559_v60 }
 0xd32   :  { %v2290_v37 = vpop.eup %2289  ;;  %v1444_v39 = vpop.f32.mrf.mxu2  ;;  %1632 = vmatpush.bf16.msra.mxu1 %v2129_v1 }
 0xd33   :  { %v1396_v15 = vmul.f32 %v2290_v37, %v2280_v23  ;;  %v2292_v41 = vpop.eup %2291 }
 0xd34   :  { %2044 = vmatmul.msk.bf16.vlgmr.msra.gmra.mxu0 %vm276_vm11, %v1405_v38  ;;  %v1395_v42 = vmul.f32 %v2292_v41, %v2674_v53 }
 0xd35   :  { %v1404_v2 = vpack.c.bf16 %v1396_v15, %v1396_v15  ;;  %v1423_v57 = vpop.f32.mrf.mxu1 }
 0xd36   :  { %v1403_v47 = vpack.c.bf16 %v1395_v42, %v1395_v42  ;;  %1633 = vmatpush.bf16.msra.mxu1 %v2128_v3 }
 0xd37   :  { %2043 = vmatmul.msk.bf16.vlgmr.msrb.gmra.mxu3 %vm276_vm11, %v1404_v2 }
 0xd3a   :  { %v1446_v51 = vpop.f32.mrf.mxu2 }
 0xd3b   :  { %v2130_v51 = vld [vmem:[#allocation2 + $0xd8] sm:$0xff] }
 0xd3d   :  { %v1425_v40 = vpop.f32.mrf.mxu1 }
 0xd3e   :  { %v2139_v40 = vld [vmem:[#allocation2 + $0x120] sm:$0xff] }
 0xd3f   :  { %1799 = vmatpush.bf16.msra.mxu3 %v2139_v40  ;;  %v2140_v40 = vld [vmem:[#allocation2 + $0x128] sm:$0xff] }
 0xd43   :  { %v1512_v43 = vpop.permute.xlu1 %1511 }
 0xd44   :  { %v1517_v46 = vsel %vm583_vm13, %v1512_v43, 0  ;;  %v2138_v43 = vld [vmem:[#allocation2 + $0x118] sm:$0xff] }
 0xd45   :  { %1526 = vmatpush.bf16.msra.mxu2 %v1517_v46  ;;  %1800 = vmatpush.bf16.msra.mxu3 %v2138_v43 }
 0xd48   :  { %2042 = vmatmul.msk.bf16.vlgmr.msra.gmra.mxu2 %vm276_vm11, %v1403_v47 }
 0xd9d   :  { %v1486_v48 = vpop.f32.mrf.mxu0 }
 0xda4   :  { %v1465_v50 = vpop.f32.mrf.mxu3 }
 0xda5   :  { %v2183_v52 = vpack.i.bf16 %v1486_v48, %v1465_v50  ;;  %v1488_v49 = vpop.f32.mrf.mxu0  ;;  %v2137_v50 = vld [vmem:[#allocation2 + $0x110] sm:$0xff] }
 0xda6   :  { %1801 = vmatpush.bf16.msra.mxu3 %v2137_v50 }
 0xda7   :  { %2184 = vrot.lane.b32.xlu1 %v2183_v52, %s2358_s1 }
 0xdac   :  { %v1467_v54 = vpop.f32.mrf.mxu3 }
 0xdad   :  { %v2136_v54 = vld [vmem:[#allocation2 + $0x108] sm:$0xff] }
 0xdae   :  { %v1507_v55 = vpop.f32.mrf.mxu1  ;;  %1802 = vmatpush.bf16.msra.mxu3 %v2136_v54 }
 0xdb1   :  { %v1570_v56 = vpop.f32.mrf.mxu0 }
 0xdb6   :  { %v1509_v44 = vpop.f32.mrf.mxu1 }
 0xdb9   :  { %v1572_v58 = vpop.f32.mrf.mxu0 }
 0xdba   :  { %v1549_v59 = vpop.f32.mrf.mxu3 }
 0xdbb   :  { %v2193_v53 = vpack.i.bf16 %v1570_v56, %v1549_v59 }
 0xdbd   :  { %2194 = vrot.lane.b32.xlu0 %v2193_v53, %s2366_s4 }
 0xdc2   :  { %v1551_v61 = vpop.f32.mrf.mxu3 }
 0xdcb   :  { %v1528_v32 = vpop.f32.mrf.mxu2 }
 0xdcc   :  { %v2188_v63 = vpack.i.bf16 %v1528_v32, %v1507_v55 }
 0xdce   :  { %2189 = vrot.lane.b32.xlu2 %v2188_v63, %s2367_s5  ;;  %v2208_v63 = vld [vmem:[#allocation4 + $0x9] ss:$0 sm:$0xff] }
 0xdd3   :  { %v1530_v12 = vpop.f32.mrf.mxu2 }
 0xe19   :  { %v2185_v19 = vpop.permute.xlu1 %2184 }
 0xe1a   :  { %v2187_v6 = vunpack.i.h.bf16 %v2185_v19  ;;  %v2186_v23 = vunpack.i.l.bf16 %v2185_v19  ;;  %v2209_v19 = vld [vmem:[#allocation4 + $0xa] ss:$0 sm:$0xff] }
 0xe1c   :  { %v1599_v16 = vsel %vm276_vm11, %v1444_v39, %v2187_v6  ;;  %v1598_v8 = vsel %vm276_vm11, %v1423_v57, %v2186_v23 }
 0xe28   :  { %v2190_v5 = vpop.permute.xlu2 %2189 }
 0xe29   :  { %v2192_v9 = vunpack.i.h.bf16 %v2190_v5  ;;  %v2191_v10 = vunpack.i.l.bf16 %v2190_v5 }
 0xe2b   :  { %v1600_v45 = vsel %vm773_vm14, %v1598_v8, %v2191_v10  ;;  %v1601_v18 = vsel %vm773_vm14, %v1599_v16, %v2192_v9  ;;  %v2135_v16 = vld [vmem:[#allocation2 + $0x100] sm:$0xff]  ;;  %v2134_v8 = vld [vmem:[#allocation2 + $0xf8] sm:$0xff] }
 0xe2c   :  { %1803 = vmatpush.bf16.msra.mxu3 %v2135_v16 }
 0xe2f   :  { %v2195_v11 = vpop.permute.xlu0 %2194 }
 0xe30   :  { %v2197_v4 = vunpack.i.h.bf16 %v2195_v11  ;;  %v2196_v17 = vunpack.i.l.bf16 %v2195_v11  ;;  %1804 = vmatpush.bf16.msra.mxu3 %v2134_v8 }
 0xe32   :  { %v1603_v20 = vsel %vm776_vm15, %v1601_v18, %v2197_v4  ;;  %v1602_v21 = vsel %vm776_vm15, %v1600_v45, %v2196_v17  ;;  %v2133_v4 = vld [vmem:[#allocation2 + $0xf0] sm:$0xff]  ;;  %v2132_v17 = vld [vmem:[#allocation2 + $0xe8] sm:$0xff]  ;;  %v2210_v18 = vld [vmem:[#allocation4 + $0xc] ss:$0 sm:$0xff] }
 0xe33   :  { %v1609_v22 = vpack.c.bf16 %v1603_v20, %v1602_v21 }
 0xe34   :  { %1805 = vmatpush.bf16.msra.mxu3 %v2133_v4 }
 0xe35   :  { %2053 = vmatmul.msk.bf16.vlgmr.msra.gmra.mxu1 %vm151_vm3, %v1609_v22 }
 0xe38   :  { %1806 = vmatpush.bf16.msra.mxu3 %v2132_v17 }
 0xeb2   :  { %v1635_v26 = vpop.f32.mrf.mxu1 }
 0xeb3   :  { %v1636_v7 = vadd.f32 %v2207_v24, %v1635_v26 }
 0xeb5   :  { %v1640_v13 = vadd.f32 %v1636_v7, %v2563_v62 }
 0xeb7   :  { %v1644_v14 = vsel %vm151_vm3, %v1640_v13, 0.0 }
 0xeb8   :  { %1645 = vadd.xlane.f32.xlu1 %v1644_v14 }
 0xeba   :  { %v1637_v27 = vpop.f32.mrf.mxu1 }
 0xebb   :  { %v1638_v28 = vadd.f32 %v2207_v24, %v1637_v27 }
 0xebd   :  { %v1641_v29 = vadd.f32 %v1638_v28, %v2567_v0  ;;  %v2131_v0 = vld [vmem:[#allocation2 + $0xe0] sm:$0xff] }
 0xebe   :  { %1739 = vmatpush.bf16.msrb.mxu2 %v2131_v0 }
 0xebf   :  { %v1647_v30 = vsel %vm151_vm3, %v1641_v29, 0.0 }
 0xec0   :  { %1648 = vadd.xlane.f32.xlu2 %v1647_v30 }
 0xec2   :  { %1740 = vmatpush.bf16.msrb.mxu2 %v2130_v51 }
 0xf2b   :  { %v1646_v25 = vpop.xlane.xlu1 %1645 }
 0xf2c   :  { %v1650_v33 = vmul.f32 %v1646_v25, %v2416_v31 }
 0xf2e   :  { %v1652_v34 = vsub.f32 %v1640_v13, %v1650_v33  ;;  %v2211_v13 = vld [vmem:[#allocation4 + $0xd] ss:$0 sm:$0xff] }
 0xf30   :  { %v1654_v35 = vmul.f32 %v1652_v34, %v1652_v34 }
 0xf32   :  { %v1656_v36 = vsel %vm151_vm3, %v1654_v35, 0.0 }
 0xf33   :  { %v1649_v60 = vpop.xlane.xlu2 %1648  ;;  %1657 = vadd.xlane.f32.xlu0 %v1656_v36 }
 0xf34   :  { %v1651_v62 = vmul.f32 %v1649_v60, %v2416_v31 }
 0xf36   :  { %v1653_v37 = vsub.f32 %v1641_v29, %v1651_v62 }
 0xf38   :  { %v1655_v38 = vmul.f32 %v1653_v37, %v1653_v37 }
 0xf3a   :  { %v1659_v39 = vsel %vm151_vm3, %v1655_v38, 0.0 }
 0xf3b   :  { %1660 = vadd.xlane.f32.xlu1 %v1659_v39 }
 0xfa6   :  { %v1658_v15 = vpop.xlane.xlu0 %1657 }
 0xfa7   :  { %v1662_v2 = vmul.f32 %v1658_v15, %v2416_v31  ;;  %v2141_v15 = vld [vmem:[#allocation2 + $0x130] sm:$0xff] }
 0xfa8   :  { %1893 = vmatpush.bf16.msrb.mxu0 %v2141_v15 }
 0xfa9   :  { %v1664_v57 = vadd.f32 1e-05, %v1662_v2 }
 0xfab   :  { %2293 = vrsqrt.f32 %v1664_v57  ;;  %vm1672_vm12 = vweird.f32 %v1664_v57 }
 0xfac   :  { %1894 = vmatpush.bf16.msrb.mxu0 %v2140_v40 }
 0xfae   :  { %v1661_v41 = vpop.xlane.xlu1 %1660 }
 0xfaf   :  { %v1663_v42 = vmul.f32 %v1661_v41, %v2416_v31 }
 0xfb1   :  { %v2294_v46 = vpop.eup %2293  ;;  %v1665_v47 = vadd.f32 1e-05, %v1663_v42 }
 0xfb2   :  { %v1667_v48 = vmul.f32 %v2294_v46, %v1664_v57  ;;  %vm1673_vm11 = vweird.f32 %v2294_v46 }
 0xfb3   :  { %2295 = vrsqrt.f32 %v1665_v47  ;;  %vm1674_vm13 = vmor %vm1672_vm12, %vm1673_vm11  ;;  %vm1682_vm15 = vweird.f32 %v1665_v47 }
 0xfb4   :  { %v1668_v52 = vmul.f32 %v2294_v46, %v1667_v48 }
 0xfb6   :  { %v1669_v49 = vmul.f32 0.5, %v1668_v52 }
 0xfb8   :  { %v1670_v55 = vsub.f32 1.5, %v1669_v49 }
 0xfb9   :  { %v2296_v56 = vpop.eup %2295 }
 0xfba   :  { %v1671_v44 = vmul.f32 %v2294_v46, %v1670_v55  ;;  %v1677_v58 = vmul.f32 %v2296_v56, %v1665_v47  ;;  %vm1683_vm14 = vweird.f32 %v2296_v56 }
 0xfbb   :  { %vm1684_vm2 = vmor %vm1682_vm15, %vm1683_vm14 }
 0xfbc   :  { %v1678_v59 = vmul.f32 %v2296_v56, %v1677_v58  ;;  %v1675_v53 = vsel %vm1674_vm13, %v2294_v46, %v1671_v44 }
 0xfbd   :  { %v1686_v12 = vmul.f32 %v1675_v53, %v1652_v34  ;;  %v2212_v53 = vld [vmem:[#allocation4 + $0xe] ss:$0 sm:$0xff] }
 0xfbe   :  { %v1679_v61 = vmul.f32 0.5, %v1678_v59 }
 0xfbf   :  { %v1689_v5 = vmul.f32 %v2208_v63, %v1686_v12 }
 0xfc0   :  { %v1680_v32 = vsub.f32 1.5, %v1679_v61 }
 0xfc1   :  { %v1692_v9 = vadd.f32 %v2209_v19, %v1689_v5 }
 0xfc2   :  { %v1681_v1 = vmul.f32 %v2296_v56, %v1680_v32 }
 0xfc4   :  { %v1685_v3 = vsel %vm1684_vm2, %v2296_v56, %v1681_v1 }
 0xfc5   :  { %v1687_v6 = vmul.f32 %v1685_v3, %v1653_v37 }
 0xfc7   :  { %v1690_v23 = vmul.f32 %v2208_v63, %v1687_v6  ;;  %v2213_v63 = vld [vmem:[#allocation4 + $0xf] ss:$0 sm:$0xff] }
 0xfc9   :  { %v1693_v10 = vadd.f32 %v2209_v19, %v1690_v23  ;;  %v2214_v23 = vld [vmem:[#allocation4 + $0x10] ss:$0 sm:$0xff] }
 0xfcb   :  { %v1716_v11 = vpack.c.bf16 %v1693_v10, %v1692_v9 }
 0xfcd   :  { %2062 = vmatmul.msk.bf16.vlgmr.msrb.gmra.mxu2 %vm151_vm3, %v1716_v11 }
0x1050   :  { %v1742_v45 = vpop.f32.mrf.mxu2 }
0x1051   :  { %v1743_v20 = vadd.f32 %v2210_v18, %v1742_v45 }
0x1053   :  { %v1747_v24 = vmax.f32 %v1743_v20, 0.0 }
0x1058   :  { %v1744_v21 = vpop.f32.mrf.mxu2 }
0x1059   :  { %v1745_v22 = vadd.f32 %v2210_v18, %v1744_v21 }
0x105b   :  { %v1748_v26 = vmax.f32 %v1745_v22, 0.0 }
0x105d   :  { %v1749_v7 = vpack.c.bf16 %v1748_v26, %v1747_v24 }
0x105f   :  { %1807 = vmatmul.bf16.vlgmr.msra.gmra.mxu3 %v1749_v7 }
0x10e2   :  { %v1808_v14 = vpop.f32.mrf.mxu3 }
0x10e3   :  { %v1809_v27 = vadd.f32 %v2211_v13, %v1808_v14 }
0x10e5   :  { %v1815_v28 = vsel %vm151_vm3, %v1809_v27, 0.0 }
0x10e6   :  { %1816 = vadd.xlane.f32.xlu2 %v1815_v28 }
0x10ea   :  { %v1810_v29 = vpop.f32.mrf.mxu3 }
0x10eb   :  { %v1811_v30 = vadd.f32 %v2211_v13, %v1810_v29 }
0x10ed   :  { %v1818_v25 = vsel %vm151_vm3, %v1811_v30, 0.0 }
0x10ee   :  { %1819 = vadd.xlane.f32.xlu0 %v1818_v25 }
0x1159   :  { %v1817_v33 = vpop.xlane.xlu2 %1816 }
0x115a   :  { %v1821_v34 = vmul.f32 %v1817_v33, %v2416_v31 }
0x115c   :  { %v1823_v35 = vsub.f32 %v1809_v27, %v1821_v34 }
0x115e   :  { %v1825_v36 = vmul.f32 %v1823_v35, %v1823_v35 }
0x1160   :  { %v1827_v60 = vsel %vm151_vm3, %v1825_v36, 0.0 }
0x1161   :  { %v1820_v62 = vpop.xlane.xlu0 %1819  ;;  %1828 = vadd.xlane.f32.xlu1 %v1827_v60 }
0x1162   :  { %v1822_v37 = vmul.f32 %v1820_v62, %v2416_v31 }
0x1164   :  { %v1824_v38 = vsub.f32 %v1811_v30, %v1822_v37 }
0x1166   :  { %v1826_v39 = vmul.f32 %v1824_v38, %v1824_v38 }
0x1168   :  { %v1830_v0 = vsel %vm151_vm3, %v1826_v39, 0.0 }
0x1169   :  { %1831 = vadd.xlane.f32.xlu2 %v1830_v0 }
0x11d4   :  { %v1829_v2 = vpop.xlane.xlu1 %1828 }
0x11d5   :  { %v1833_v57 = vmul.f32 %v1829_v2, %v2416_v31 }
0x11d7   :  { %v1835_v51 = vadd.f32 1e-05, %v1833_v57 }
0x11d9   :  { %2297 = vrsqrt.f32 %v1835_v51  ;;  %vm1843_vm5 = vweird.f32 %v1835_v51 }
0x11dc   :  { %v1832_v41 = vpop.xlane.xlu2 %1831 }
0x11dd   :  { %v1834_v42 = vmul.f32 %v1832_v41, %v2416_v31 }
0x11df   :  { %v2298_v43 = vpop.eup %2297  ;;  %v1836_v46 = vadd.f32 1e-05, %v1834_v42 }
0x11e0   :  { %v1838_v47 = vmul.f32 %v2298_v43, %v1835_v51  ;;  %vm1844_vm4 = vweird.f32 %v2298_v43 }
0x11e1   :  { %2299 = vrsqrt.f32 %v1836_v46  ;;  %vm1845_vm6 = vmor %vm1843_vm5, %vm1844_vm4  ;;  %vm1853_vm8 = vweird.f32 %v1836_v46 }
0x11e2   :  { %v1839_v48 = vmul.f32 %v2298_v43, %v1838_v47 }
0x11e4   :  { %v1840_v50 = vmul.f32 0.5, %v1839_v48 }
0x11e6   :  { %v1841_v52 = vsub.f32 1.5, %v1840_v50 }
0x11e7   :  { %v2300_v49 = vpop.eup %2299 }
0x11e8   :  { %v1842_v54 = vmul.f32 %v2298_v43, %v1841_v52  ;;  %v1848_v55 = vmul.f32 %v2300_v49, %v1836_v46  ;;  %vm1854_vm7 = vweird.f32 %v2300_v49 }
0x11e9   :  { %vm1855_vm9 = vmor %vm1853_vm8, %vm1854_vm7 }
0x11ea   :  { %v1849_v56 = vmul.f32 %v2300_v49, %v1848_v55  ;;  %v1846_v44 = vsel %vm1845_vm6, %v2298_v43, %v1842_v54 }
0x11eb   :  { %v1857_v31 = vmul.f32 %v1846_v44, %v1823_v35 }
0x11ec   :  { %v1850_v58 = vmul.f32 0.5, %v1849_v56 }
0x11ed   :  { %v1860_v12 = vmul.f32 %v2212_v53, %v1857_v31 }
0x11ee   :  { %v1851_v59 = vsub.f32 1.5, %v1850_v58 }
0x11ef   :  { %v1863_v19 = vadd.f32 %v2213_v63, %v1860_v12 }
0x11f0   :  { %v1852_v61 = vmul.f32 %v2300_v49, %v1851_v59 }
0x11f2   :  { %v1856_v32 = vsel %vm1855_vm9, %v2300_v49, %v1852_v61 }
0x11f3   :  { %v1858_v1 = vmul.f32 %v1856_v32, %v1824_v38 }
0x11f5   :  { %v1861_v3 = vmul.f32 %v2212_v53, %v1858_v1 }
0x11f7   :  { %v1864_v5 = vadd.f32 %v2213_v63, %v1861_v3 }
0x11f9   :  { %v1870_v6 = vpack.c.bf16 %v1864_v5, %v1863_v19 }
0x11fb   :  { %2103 = vmatmul.msk.bf16.vlgmr.msrb.gmra.mxu0 %vm151_vm3, %v1870_v6 }
0x1278   :  { %v1896_v9 = vpop.f32.mrf.mxu0 }
0x1279   :  { %v1897_v10 = vadd.f32 %v2214_v23, %v1896_v9 }
0x127b   :  { %1901 = vst [vmem:[%s2745_s3] sm:$0xff] %v1897_v10 }
0x1280   :  { %v1898_v11 = vpop.f32.mrf.mxu0 }
0x1281   :  { %v1899_v16 = vadd.f32 %v2214_v23, %v1898_v11 }
0x1283   :  { %1902 = vst [vmem:[%s2745_s3 + $0x8] sm:$0xff] %v1899_v16 }
0x1284   :  { %1907 = vsyncpa [#allocation3], 1 }
0x1285   :  { %1908 = vsyncpa [#allocation5], 1 }

</bundles_post_ra>
